<compile_context>
chip_gen: v7x
topology: tpu7x:2x2x1
jax: 0.10.0
libtpu: 0.0.40
codegen_flags: <defaults>
</compile_context>

<pallas_src>
import jax
import jax.numpy as jnp
from jax.experimental import pallas as pl
from jax.experimental.pallas import tpu as pltpu


def _round_up(n, m):
    return (n + m - 1) // m * m


def _cdiv(a, b):
    return (a + b - 1) // b


def _tpu_vmem_capacity_bytes():
    """Physical per-core VMEM; conservative 64 MiB fallback if query fails."""
    try:
        info = pltpu.get_tpu_info()
        cap = int(getattr(info, "vmem_capacity_bytes", 0))
        if cap > 0:
            return cap
    except Exception:
        pass
    return 64 << 20


# ----------------------------- Pallas kernels ---------------------------------

def mlp_kernel(x_ref, w1_ref, b1_ref, w2_ref, b2_ref, w3_ref, b3_ref, o_ref):
    # x arrives f32 and is cast to bf16 in-kernel (VPU has slack; saves a
    # wrapper-side HBM round trip).  All matmuls accumulate in f32 on the MXU.
    x = x_ref[...].astype(jnp.bfloat16)
    h = jnp.dot(x, w1_ref[...], preferred_element_type=jnp.float32)
    h = jnp.maximum(h + b1_ref[...], 0.0)                      # dense1 + ReLU

    h = jnp.dot(h.astype(jnp.bfloat16), w2_ref[...],
                preferred_element_type=jnp.float32)
    h = jnp.maximum(h + b2_ref[...], 0.0)                      # dense2 + ReLU

    out = jnp.dot(h.astype(jnp.bfloat16), w3_ref[...],
                  preferred_element_type=jnp.float32)
    o_ref[...] = (out + b3_ref[...]).astype(o_ref.dtype)       # dense3


def mlp_kernel_latency(x_ref, w1_ref, b1_ref, w2_hbm, b2_ref, w3_hbm, b3_ref,
                       o_ref, w2_vmem, w3_vmem, dma_sem):
    # Small-batch / latency path: W2 and W3 stay in HBM and are fetched into
    # single-buffered VMEM scratch, overlapped with the layer-1 matmul instead
    # of sitting in the pipeline prologue.  Scratch persists across the
    # (sequential, "arbitrary") grid, so the fetch happens only at step 0.
    @pl.when(pl.program_id(0) == 0)
    def _start_fetch():
        pltpu.make_async_copy(w2_hbm, w2_vmem, dma_sem.at[0]).start()
        pltpu.make_async_copy(w3_hbm, w3_vmem, dma_sem.at[1]).start()

    x = x_ref[...].astype(jnp.bfloat16)
    h = jnp.dot(x, w1_ref[...], preferred_element_type=jnp.float32)
    h = jnp.maximum(h + b1_ref[...], 0.0)                      # dense1 + ReLU

    @pl.when(pl.program_id(0) == 0)
    def _wait_w2():
        pltpu.make_async_copy(w2_hbm, w2_vmem, dma_sem.at[0]).wait()

    h = jnp.dot(h.astype(jnp.bfloat16), w2_vmem[...],
                preferred_element_type=jnp.float32)
    h = jnp.maximum(h + b2_ref[...], 0.0)                      # dense2 + ReLU

    @pl.when(pl.program_id(0) == 0)
    def _wait_w3():
        pltpu.make_async_copy(w3_hbm, w3_vmem, dma_sem.at[1]).wait()

    out = jnp.dot(h.astype(jnp.bfloat16), w3_vmem[...],
                  preferred_element_type=jnp.float32)
    o_ref[...] = (out + b3_ref[...]).astype(o_ref.dtype)       # dense3


# ------------------------------- wrapper --------------------------------------

def _const_spec(arr, single_buffer):
    """Grid-invariant parameter block: constant index_map, fetched once.
    Single-buffered when supported (the default pipeline would allocate a dead
    second buffer for every grid-invariant input)."""
    r, c = arr.shape
    index_map = lambda i: (0, 0)
    if single_buffer and hasattr(pl, "Buffered"):
        try:
            return pl.BlockSpec((r, c), index_map, pipeline_mode=pl.Buffered(1))
        except TypeError:  # older jax without pipeline_mode kwarg
            pass
    return pl.BlockSpec((r, c), index_map)


def _moa_mlp_forward(x, kp, *, tb=None, conservative=False):
    B, F = x.shape
    H = kp["w1"].shape[1]
    Tp = kp["w3"].shape[1]          # padded (lane-dense) target dim
    T = kp["num_targets"]

    vmem_cap = _tpu_vmem_capacity_bytes()
    big_vmem = vmem_cap >= (100 << 20)            # v5e/v6e (128 MiB) vs v7x (64 MiB)
    vmem_ceiling = min(int(vmem_cap * 0.80), 100 << 20)

    if tb is None:
        tb = 512 if big_vmem else 256             # big tiles where VMEM allows
    tb_eff = max(16, min(_round_up(tb, 16), _round_up(B, 16)))
    n_steps = _cdiv(B, tb_eff)                    # ragged last block is fine
    grid = (n_steps,)

    nbytes = lambda a: a.size * a.dtype.itemsize
    w_bytes = sum(nbytes(kp[k]) for k in ("w1", "w2", "w3"))
    b_bytes = sum(nbytes(kp[k]) for k in ("b1", "b2", "b3"))

    single_buffer = not conservative
    # Latency regime: few grid steps -> weight DMA dominates.  Run the grid
    # sequentially (no duplicated weight fetch per v7x core) and overlap the
    # W2/W3 fetch with the layer-1 matmul of the first tile.
    use_latency = (not conservative) and n_steps <= 2

    x_spec = pl.BlockSpec((tb_eff, F), lambda i: (i, 0))
    out_spec = pl.BlockSpec((tb_eff, Tp), lambda i: (i, 0))

    # activation VMEM: double-buffered x/out tiles + in-kernel intermediates
    act_bytes = tb_eff * (2 * F * x.dtype.itemsize + 2 * Tp * 4
                          + F * 2 + 2 * H * (4 + 2))

    flops = 2 * B * (F * H + H * H + H * Tp)
    bytes_accessed = B * F * x.dtype.itemsize + w_bytes + b_bytes + B * Tp * 4
    cost = pl.CostEstimate(flops=flops, transcendentals=0,
                           bytes_accessed=bytes_accessed)

    if use_latency:
        in_specs = [
            x_spec,
            _const_spec(kp["w1"], single_buffer),
            _const_spec(kp["b1"], single_buffer),
            pl.BlockSpec(memory_space=pl.ANY),            # W2 stays in HBM
            _const_spec(kp["b2"], single_buffer),
            pl.BlockSpec(memory_space=pl.ANY),            # W3 stays in HBM
            _const_spec(kp["b3"], single_buffer),
        ]
        scratch = [
            pltpu.VMEM(kp["w2"].shape, kp["w2"].dtype),
            pltpu.VMEM(kp["w3"].shape, kp["w3"].dtype),
            pltpu.SemaphoreType.DMA((2,)),
        ]
        resident = (nbytes(kp["w1"]) * (1 if single_buffer else 2)
                    + nbytes(kp["w2"]) + nbytes(kp["w3"]) + 2 * b_bytes)
        kernel = mlp_kernel_latency
        semantics = ("arbitrary",)
    else:
        in_specs = [
            x_spec,
            _const_spec(kp["w1"], single_buffer),
            _const_spec(kp["b1"], single_buffer),
            _const_spec(kp["w2"], single_buffer),
            _const_spec(kp["b2"], single_buffer),
            _const_spec(kp["w3"], single_buffer),
            _const_spec(kp["b3"], single_buffer),
        ]
        scratch = []
        resident = w_bytes * (1 if single_buffer else 2) + 2 * b_bytes
        kernel = mlp_kernel
        semantics = ("parallel",)

    vmem_limit = int(max(min(resident + act_bytes + (8 << 20), vmem_ceiling),
                         min(32 << 20, vmem_ceiling)))

    out = pl.pallas_call(
        kernel,
        out_shape=jax.ShapeDtypeStruct((B, Tp), jnp.float32),
        grid_spec=pltpu.PrefetchScalarGridSpec(
            num_scalar_prefetch=0,
            grid=grid,
            in_specs=in_specs,
            out_specs=out_spec,
            scratch_shapes=scratch,
        ),
        compiler_params=pltpu.CompilerParams(
            dimension_semantics=semantics,
            vmem_limit_bytes=vmem_limit,
        ),
        cost_estimate=cost,
    )(x, kp["w1"], kp["b1"], kp["w2"], kp["b2"], kp["w3"], kp["b3"])

    return out[:, :T]


def moa_mlp_forward(x, kp, *, tb=None):
    """x: [B, num_features] float32. Returns [B, num_targets] float32."""
    try:
        return _moa_mlp_forward(x, kp, tb=tb, conservative=False)
    except Exception:
        # Conservative fallback: plain double-buffered auto-pipelined path.
        return _moa_mlp_forward(x, kp, tb=tb, conservative=True)


# --------------------- parameter construction / folding (plain JAX) -----------

def make_model_params(key, num_features, hidden_size, num_targets):
    """Random parameters mimicking the PyTorch Model at init (eval mode)."""
    ks = jax.random.split(key, 6)

    def bn(k, c):
        k1, k2, k3, k4 = jax.random.split(k, 4)
        return dict(
            gamma=jax.random.uniform(k1, (c,), jnp.float32, 0.5, 1.5),
            beta=jax.random.uniform(k2, (c,), jnp.float32, -0.5, 0.5),
            mean=jax.random.uniform(k3, (c,), jnp.float32, -0.5, 0.5),
            var=jax.random.uniform(k4, (c,), jnp.float32, 0.5, 1.5),
        )

    def wn_linear(k, fan_in, fan_out):
        kv, kg, kb = jax.random.split(k, 3)
        bound = 1.0 / jnp.sqrt(fan_in)
        return dict(
            v=jax.random.uniform(kv, (fan_out, fan_in), jnp.float32, -bound, bound),
            g=jax.random.uniform(kg, (fan_out,), jnp.float32, 0.5, 1.5),
            b=jax.random.uniform(kb, (fan_out,), jnp.float32, -bound, bound),
        )

    return dict(
        bn1=bn(ks[0], num_features),
        bn2=bn(ks[1], hidden_size),
        bn3=bn(ks[2], hidden_size),
        fc1=wn_linear(ks[3], num_features, hidden_size),
        fc2=wn_linear(ks[4], hidden_size, hidden_size),
        fc3=wn_linear(ks[5], hidden_size, num_targets),
    )


def _bn_affine(p, eps=1e-5):
    scale = p["gamma"] / jnp.sqrt(p["var"] + eps)
    bias = p["beta"] - p["mean"] * scale
    return scale, bias


def _wn_weight(p):
    v, g = p["v"], p["g"]
    w = g[:, None] * v / jnp.sqrt(jnp.sum(v * v, axis=1, keepdims=True))  # (out, in)
    return w.T, p["b"]                                                    # (in, out)


def fold_params(raw, num_targets):
    """Fold BN affines into the following weight-normed Linear, pad the output
    dim to a multiple of 128, cast weights to bf16 (biases stay f32)."""
    w1, b1 = _wn_weight(raw["fc1"])
    w2, b2 = _wn_weight(raw["fc2"])
    w3, b3 = _wn_weight(raw["fc3"])
    s1, o1 = _bn_affine(raw["bn1"])
    s2, o2 = _bn_affine(raw["bn2"])
    s3, o3 = _bn_affine(raw["bn3"])

    # (x*s + o) @ W + b  ==  x @ (s[:,None]*W) + (o @ W + b)
    w1f, b1f = s1[:, None] * w1, o1 @ w1 + b1
    w2f, b2f = s2[:, None] * w2, o2 @ w2 + b2
    w3f, b3f = s3[:, None] * w3, o3 @ w3 + b3

    t_pad = _round_up(num_targets, 128)
    if t_pad != num_targets:
        w3f = jnp.pad(w3f, ((0, 0), (0, t_pad - num_targets)))
        b3f = jnp.pad(b3f, (0, t_pad - num_targets))

    return dict(
        w1=w1f.astype(jnp.bfloat16), b1=b1f[None, :].astype(jnp.float32),
        w2=w2f.astype(jnp.bfloat16), b2=b2f[None, :].astype(jnp.float32),
        w3=w3f.astype(jnp.bfloat16), b3=b3f[None, :].astype(jnp.float32),
        num_targets=num_targets,
    )


# ------------------------------- references -----------------------------------

def reference_forward_f32(x, raw, eps=1e-5):
    """Mirror of the PyTorch Model.forward in eval mode, pure f32."""
    def bn(h, p):
        return (h - p["mean"]) / jnp.sqrt(p["var"] + eps) * p["gamma"] + p["beta"]
    w1, b1 = _wn_weight(raw["fc1"])
    w2, b2 = _wn_weight(raw["fc2"])
    w3, b3 = _wn_weight(raw["fc3"])
    h = bn(x, raw["bn1"])                                # dropout1 = identity
    h = jnp.maximum(h @ w1 + b1, 0.0)
    h = bn(h, raw["bn2"])                                # dropout2 = identity
    h = jnp.maximum(h @ w2 + b2, 0.0)
    h = bn(h, raw["bn3"])                                # dropout3 = identity
    return h @ w3 + b3


def reference_forward_folded(x, kp):
    """Exactly the kernel's math (folded BN, bf16 weights, f32 accumulation)."""
    T = kp["num_targets"]
    h = jnp.dot(x.astype(jnp.bfloat16), kp["w1"], preferred_element_type=jnp.float32)
    h = jnp.maximum(h + kp["b1"], 0.0)
    h = jnp.dot(h.astype(jnp.bfloat16), kp["w2"], preferred_element_type=jnp.float32)
    h = jnp.maximum(h + kp["b2"], 0.0)
    out = jnp.dot(h.astype(jnp.bfloat16), kp["w3"],
                  preferred_element_type=jnp.float32) + kp["b3"]
    return out[:, :T]


if __name__ == "__main__":
    # Small stand-ins for (num_features=875, hidden=2048, num_targets=206);
    # batch deliberately non-aligned to exercise ragged edge blocks.
    batch, num_features, hidden_size, num_targets = 50, 200, 256, 50

    key = jax.random.PRNGKey(0)
    kx, kx2, kp_key = jax.random.split(key, 3)
    x = jax.random.normal(kx, (batch, num_features), jnp.float32)
    raw = make_model_params(kp_key, num_features, hidden_size, num_targets)
    kparams = fold_params(raw, num_targets)

    # --- small batch -> latency path (single grid step, overlapped W2/W3 DMA)
    out = jax.block_until_ready(moa_mlp_forward(x, kparams))
    assert out.shape == (batch, num_targets)

    ref_folded = reference_forward_folded(x, kparams)
    assert jnp.allclose(out, ref_folded, atol=1e-2, rtol=1e-2), \
        float(jnp.max(jnp.abs(out - ref_folded)))

    ref_f32 = reference_forward_f32(x, raw)
    rel_err = float(jnp.linalg.norm(out - ref_f32) / jnp.linalg.norm(ref_f32))
    assert rel_err < 2e-2, rel_err

    # --- larger ragged batch with small tiles -> throughput path
    #     (multi-step "parallel" grid, resident single-buffered weights)
    batch2 = 700
    x2 = jax.random.normal(kx2, (batch2, num_features), jnp.float32)
    out2 = jax.block_until_ready(moa_mlp_forward(x2, kparams, tb=128))
    assert out2.shape == (batch2, num_targets)
    ref2 = reference_forward_folded(x2, kparams)
    assert jnp.allclose(out2, ref2, atol=1e-2, rtol=1e-2), \
        float(jnp.max(jnp.abs(out2 - ref2)))

    print("KERNEL_OK")
</pallas_src>

<mosaic_0001>
module attributes {stable_mosaic.version = 11 : i64} {
  func.func @mlp_kernel_latency(%arg0: i32, %arg1: memref<64x200xf32, #tpu.memory_space<vmem>>, %arg2: memref<200x256xbf16, #tpu.memory_space<vmem>>, %arg3: memref<1x256xf32, #tpu.memory_space<vmem>>, %arg4: memref<256x256xbf16, #tpu.memory_space<any>>, %arg5: memref<1x256xf32, #tpu.memory_space<vmem>>, %arg6: memref<256x128xbf16, #tpu.memory_space<any>>, %arg7: memref<1x128xf32, #tpu.memory_space<vmem>>, %arg8: memref<64x128xf32, #tpu.memory_space<vmem>>, %arg9: memref<256x256xbf16, #tpu.memory_space<vmem>>, %arg10: memref<256x128xbf16, #tpu.memory_space<vmem>>, %arg11: memref<2x!tpu.dma_semaphore, #tpu.memory_space<semaphore_mem>>) attributes {dimension_semantics = [#tpu.dimension_semantics<arbitrary>], iteration_bounds = array<i64: 1>, scalar_prefetch = 0 : i64, scratch_operands = 3 : i64, tpu.core_type = #tpu.core_type<tc>, window_params = [{transform_indices = @transform_0, window_bounds = array<i64: 64, 200>}, {pipeline_mode = #tpu.pipeline_mode<synchronous>, transform_indices = @transform_1, window_bounds = array<i64: 200, 256>}, {pipeline_mode = #tpu.pipeline_mode<synchronous>, transform_indices = @transform_2, window_bounds = array<i64: 1, 256>}, {}, {pipeline_mode = #tpu.pipeline_mode<synchronous>, transform_indices = @transform_4, window_bounds = array<i64: 1, 256>}, {}, {pipeline_mode = #tpu.pipeline_mode<synchronous>, transform_indices = @transform_6, window_bounds = array<i64: 1, 128>}, {transform_indices = @transform_7, window_bounds = array<i64: 64, 128>}]} {
    %c0_i32 = arith.constant 0 : i32
    %0 = arith.cmpi eq, %arg0, %c0_i32 : i32
    %1 = arith.extui %0 : i1 to i32
    %c0_i32_0 = arith.constant 0 : i32
    %2 = arith.cmpi ne, %1, %c0_i32_0 : i32
    scf.if %2 {
      %c0_i32_24 = arith.constant 0 : i32
      %33 = tpu.memref_slice %arg11[%c0_i32_24] : memref<2x!tpu.dma_semaphore, #tpu.memory_space<semaphore_mem>> -> memref<1x!tpu.dma_semaphore, #tpu.memory_space<semaphore_mem>>
      %34 = tpu.memref_squeeze %33 : memref<1x!tpu.dma_semaphore, #tpu.memory_space<semaphore_mem>> -> memref<!tpu.dma_semaphore, #tpu.memory_space<semaphore_mem>>
      tpu.enqueue_dma source(%arg4 : memref<256x256xbf16, #tpu.memory_space<any>>) target(%arg9 : memref<256x256xbf16, #tpu.memory_space<vmem>>) target_semaphore(%34 : memref<!tpu.dma_semaphore, #tpu.memory_space<semaphore_mem>>)
      %c1_i32 = arith.constant 1 : i32
      %35 = tpu.memref_slice %arg11[%c1_i32] : memref<2x!tpu.dma_semaphore, #tpu.memory_space<semaphore_mem>> -> memref<1x!tpu.dma_semaphore, #tpu.memory_space<semaphore_mem>>
      %36 = tpu.memref_squeeze %35 : memref<1x!tpu.dma_semaphore, #tpu.memory_space<semaphore_mem>> -> memref<!tpu.dma_semaphore, #tpu.memory_space<semaphore_mem>>
      tpu.enqueue_dma source(%arg6 : memref<256x128xbf16, #tpu.memory_space<any>>) target(%arg10 : memref<256x128xbf16, #tpu.memory_space<vmem>>) target_semaphore(%36 : memref<!tpu.dma_semaphore, #tpu.memory_space<semaphore_mem>>)
    } else {
    }
    %c0 = arith.constant 0 : index
    %c0_1 = arith.constant 0 : index
    %3 = vector.load %arg1[%c0, %c0_1] : memref<64x200xf32, #tpu.memory_space<vmem>>, vector<64x200xf32>
    %4 = arith.truncf %3 : vector<64x200xf32> to vector<64x200xbf16>
    %c0_2 = arith.constant 0 : index
    %c0_3 = arith.constant 0 : index
    %5 = vector.load %arg2[%c0_2, %c0_3] : memref<200x256xbf16, #tpu.memory_space<vmem>>, vector<200x256xbf16>
    %cst = arith.constant dense<0.000000e+00> : vector<64x256xf32>
    %6 = tpu.matmul %4, %5, %cst {dimension_numbers = #tpu.dot_dimension_numbers<[1], [0], [0], [1], [0, 0, 1, 1], [], []>} : vector<64x200xbf16>, vector<200x256xbf16>, vector<64x256xf32> -> vector<64x256xf32>
    %c0_4 = arith.constant 0 : index
    %c0_5 = arith.constant 0 : index
    %7 = vector.load %arg3[%c0_4, %c0_5] : memref<1x256xf32, #tpu.memory_space<vmem>>, vector<1x256xf32>
    %8 = vector.broadcast %7 : vector<1x256xf32> to vector<64x256xf32>
    %9 = arith.addf %6, %8 : vector<64x256xf32>
    %cst_6 = arith.constant 0.000000e+00 : f32
    %10 = vector.broadcast %cst_6 : f32 to vector<64x256xf32>
    %11 = arith.maximumf %9, %10 : vector<64x256xf32>
    %c0_i32_7 = arith.constant 0 : i32
    %12 = arith.cmpi eq, %arg0, %c0_i32_7 : i32
    %13 = arith.extui %12 : i1 to i32
    %c0_i32_8 = arith.constant 0 : i32
    %14 = arith.cmpi ne, %13, %c0_i32_8 : i32
    scf.if %14 {
      %c0_i32_24 = arith.constant 0 : i32
      %33 = tpu.memref_slice %arg11[%c0_i32_24] : memref<2x!tpu.dma_semaphore, #tpu.memory_space<semaphore_mem>> -> memref<1x!tpu.dma_semaphore, #tpu.memory_space<semaphore_mem>>
      %34 = tpu.memref_squeeze %33 : memref<1x!tpu.dma_semaphore, #tpu.memory_space<semaphore_mem>> -> memref<!tpu.dma_semaphore, #tpu.memory_space<semaphore_mem>>
      tpu.wait_dma2 semaphore(%34 : memref<!tpu.dma_semaphore, #tpu.memory_space<semaphore_mem>>) src(%arg4 : memref<256x256xbf16, #tpu.memory_space<any>>) dst(%arg9 : memref<256x256xbf16, #tpu.memory_space<vmem>>)
    } else {
    }
    %15 = arith.truncf %11 : vector<64x256xf32> to vector<64x256xbf16>
    %c0_9 = arith.constant 0 : index
    %c0_10 = arith.constant 0 : index
    %16 = vector.load %arg9[%c0_9, %c0_10] : memref<256x256xbf16, #tpu.memory_space<vmem>>, vector<256x256xbf16>
    %cst_11 = arith.constant dense<0.000000e+00> : vector<64x256xf32>
    %17 = tpu.matmul %15, %16, %cst_11 {dimension_numbers = #tpu.dot_dimension_numbers<[1], [0], [0], [1], [0, 0, 1, 1], [], []>} : vector<64x256xbf16>, vector<256x256xbf16>, vector<64x256xf32> -> vector<64x256xf32>
    %c0_12 = arith.constant 0 : index
    %c0_13 = arith.constant 0 : index
    %18 = vector.load %arg5[%c0_12, %c0_13] : memref<1x256xf32, #tpu.memory_space<vmem>>, vector<1x256xf32>
    %19 = vector.broadcast %18 : vector<1x256xf32> to vector<64x256xf32>
    %20 = arith.addf %17, %19 : vector<64x256xf32>
    %cst_14 = arith.constant 0.000000e+00 : f32
    %21 = vector.broadcast %cst_14 : f32 to vector<64x256xf32>
    %22 = arith.maximumf %20, %21 : vector<64x256xf32>
    %c0_i32_15 = arith.constant 0 : i32
    %23 = arith.cmpi eq, %arg0, %c0_i32_15 : i32
    %24 = arith.extui %23 : i1 to i32
    %c0_i32_16 = arith.constant 0 : i32
    %25 = arith.cmpi ne, %24, %c0_i32_16 : i32
    scf.if %25 {
      %c1_i32 = arith.constant 1 : i32
      %33 = tpu.memref_slice %arg11[%c1_i32] : memref<2x!tpu.dma_semaphore, #tpu.memory_space<semaphore_mem>> -> memref<1x!tpu.dma_semaphore, #tpu.memory_space<semaphore_mem>>
      %34 = tpu.memref_squeeze %33 : memref<1x!tpu.dma_semaphore, #tpu.memory_space<semaphore_mem>> -> memref<!tpu.dma_semaphore, #tpu.memory_space<semaphore_mem>>
      tpu.wait_dma2 semaphore(%34 : memref<!tpu.dma_semaphore, #tpu.memory_space<semaphore_mem>>) src(%arg6 : memref<256x128xbf16, #tpu.memory_space<any>>) dst(%arg10 : memref<256x128xbf16, #tpu.memory_space<vmem>>)
    } else {
    }
    %26 = arith.truncf %22 : vector<64x256xf32> to vector<64x256xbf16>
    %c0_17 = arith.constant 0 : index
    %c0_18 = arith.constant 0 : index
    %27 = vector.load %arg10[%c0_17, %c0_18] : memref<256x128xbf16, #tpu.memory_space<vmem>>, vector<256x128xbf16>
    %cst_19 = arith.constant dense<0.000000e+00> : vector<64x128xf32>
    %28 = tpu.matmul %26, %27, %cst_19 {dimension_numbers = #tpu.dot_dimension_numbers<[1], [0], [0], [1], [0, 0, 1, 1], [], []>} : vector<64x256xbf16>, vector<256x128xbf16>, vector<64x128xf32> -> vector<64x128xf32>
    %c0_20 = arith.constant 0 : index
    %c0_21 = arith.constant 0 : index
    %29 = vector.load %arg7[%c0_20, %c0_21] : memref<1x128xf32, #tpu.memory_space<vmem>>, vector<1x128xf32>
    %30 = vector.broadcast %29 : vector<1x128xf32> to vector<64x128xf32>
    %31 = arith.addf %28, %30 : vector<64x128xf32>
    %c0_22 = arith.constant 0 : index
    %c0_23 = arith.constant 0 : index
    %32 = vector.load %arg8[%c0_22, %c0_23] : memref<64x128xf32, #tpu.memory_space<vmem>>, vector<64x128xf32>
    tpu.vector_store %arg8[%c0_22, %c0_23], %31 {strides = array<i32>} : memref<64x128xf32, #tpu.memory_space<vmem>>, vector<64x128xf32>,
    return
  }
  func.func @transform_0(%arg0: i32) -> (i32, i32) {
    %c0_i32 = arith.constant 0 : i32
    %c0_i32_0 = arith.constant 0 : i32
    return %arg0, %c0_i32 : i32, i32
  }
  func.func @transform_1(%arg0: i32) -> (i32, i32) {
    %c0_i32 = arith.constant 0 : i32
    %c0_i32_0 = arith.constant 0 : i32
    %c0_i32_1 = arith.constant 0 : i32
    return %c0_i32, %c0_i32_0 : i32, i32
  }
  func.func @transform_2(%arg0: i32) -> (i32, i32) {
    %c0_i32 = arith.constant 0 : i32
    %c0_i32_0 = arith.constant 0 : i32
    %c0_i32_1 = arith.constant 0 : i32
    return %c0_i32, %c0_i32_0 : i32, i32
  }
  func.func @transform_4(%arg0: i32) -> (i32, i32) {
    %c0_i32 = arith.constant 0 : i32
    %c0_i32_0 = arith.constant 0 : i32
    %c0_i32_1 = arith.constant 0 : i32
    return %c0_i32, %c0_i32_0 : i32, i32
  }
  func.func @transform_6(%arg0: i32) -> (i32, i32) {
    %c0_i32 = arith.constant 0 : i32
    %c0_i32_0 = arith.constant 0 : i32
    %c0_i32_1 = arith.constant 0 : i32
    return %c0_i32, %c0_i32_0 : i32, i32
  }
  func.func @transform_7(%arg0: i32) -> (i32, i32) {
    %c0_i32 = arith.constant 0 : i32
    %c0_i32_0 = arith.constant 0 : i32
    return %arg0, %c0_i32 : i32, i32
  }
}

module attributes {stable_mosaic.version = 11 : i64} {
  func.func @mlp_kernel(%arg0: i32, %arg1: memref<64x200xf32, #tpu.memory_space<vmem>>, %arg2: memref<200x256xbf16, #tpu.memory_space<vmem>>, %arg3: memref<1x256xf32, #tpu.memory_space<vmem>>, %arg4: memref<256x256xbf16, #tpu.memory_space<vmem>>, %arg5: memref<1x256xf32, #tpu.memory_space<vmem>>, %arg6: memref<256x128xbf16, #tpu.memory_space<vmem>>, %arg7: memref<1x128xf32, #tpu.memory_space<vmem>>, %arg8: memref<64x128xf32, #tpu.memory_space<vmem>>) attributes {dimension_semantics = [#tpu.dimension_semantics<parallel>], iteration_bounds = array<i64: 1>, scalar_prefetch = 0 : i64, scratch_operands = 0 : i64, tpu.core_type = #tpu.core_type<tc>, window_params = [{transform_indices = @transform_0, window_bounds = array<i64: 64, 200>}, {pipeline_mode = #tpu.pipeline_mode<synchronous>, transform_indices = @transform_1, window_bounds = array<i64: 200, 256>}, {pipeline_mode = #tpu.pipeline_mode<synchronous>, transform_indices = @transform_2, window_bounds = array<i64: 1, 256>}, {pipeline_mode = #tpu.pipeline_mode<synchronous>, transform_indices = @transform_3, window_bounds = array<i64: 256, 256>}, {pipeline_mode = #tpu.pipeline_mode<synchronous>, transform_indices = @transform_4, window_bounds = array<i64: 1, 256>}, {pipeline_mode = #tpu.pipeline_mode<synchronous>, transform_indices = @transform_5, window_bounds = array<i64: 256, 128>}, {pipeline_mode = #tpu.pipeline_mode<synchronous>, transform_indices = @transform_6, window_bounds = array<i64: 1, 128>}, {transform_indices = @transform_7, window_bounds = array<i64: 64, 128>}]} {
    %c0 = arith.constant 0 : index
    %c0_0 = arith.constant 0 : index
    %0 = vector.load %arg1[%c0, %c0_0] : memref<64x200xf32, #tpu.memory_space<vmem>>, vector<64x200xf32>
    %1 = arith.truncf %0 : vector<64x200xf32> to vector<64x200xbf16>
    %c0_1 = arith.constant 0 : index
    %c0_2 = arith.constant 0 : index
    %2 = vector.load %arg2[%c0_1, %c0_2] : memref<200x256xbf16, #tpu.memory_space<vmem>>, vector<200x256xbf16>
    %cst = arith.constant dense<0.000000e+00> : vector<64x256xf32>
    %3 = tpu.matmul %1, %2, %cst {dimension_numbers = #tpu.dot_dimension_numbers<[1], [0], [0], [1], [0, 0, 1, 1], [], []>} : vector<64x200xbf16>, vector<200x256xbf16>, vector<64x256xf32> -> vector<64x256xf32>
    %c0_3 = arith.constant 0 : index
    %c0_4 = arith.constant 0 : index
    %4 = vector.load %arg3[%c0_3, %c0_4] : memref<1x256xf32, #tpu.memory_space<vmem>>, vector<1x256xf32>
    %5 = vector.broadcast %4 : vector<1x256xf32> to vector<64x256xf32>
    %6 = arith.addf %3, %5 : vector<64x256xf32>
    %cst_5 = arith.constant 0.000000e+00 : f32
    %7 = vector.broadcast %cst_5 : f32 to vector<64x256xf32>
    %8 = arith.maximumf %6, %7 : vector<64x256xf32>
    %9 = arith.truncf %8 : vector<64x256xf32> to vector<64x256xbf16>
    %c0_6 = arith.constant 0 : index
    %c0_7 = arith.constant 0 : index
    %10 = vector.load %arg4[%c0_6, %c0_7] : memref<256x256xbf16, #tpu.memory_space<vmem>>, vector<256x256xbf16>
    %cst_8 = arith.constant dense<0.000000e+00> : vector<64x256xf32>
    %11 = tpu.matmul %9, %10, %cst_8 {dimension_numbers = #tpu.dot_dimension_numbers<[1], [0], [0], [1], [0, 0, 1, 1], [], []>} : vector<64x256xbf16>, vector<256x256xbf16>, vector<64x256xf32> -> vector<64x256xf32>
    %c0_9 = arith.constant 0 : index
    %c0_10 = arith.constant 0 : index
    %12 = vector.load %arg5[%c0_9, %c0_10] : memref<1x256xf32, #tpu.memory_space<vmem>>, vector<1x256xf32>
    %13 = vector.broadcast %12 : vector<1x256xf32> to vector<64x256xf32>
    %14 = arith.addf %11, %13 : vector<64x256xf32>
    %cst_11 = arith.constant 0.000000e+00 : f32
    %15 = vector.broadcast %cst_11 : f32 to vector<64x256xf32>
    %16 = arith.maximumf %14, %15 : vector<64x256xf32>
    %17 = arith.truncf %16 : vector<64x256xf32> to vector<64x256xbf16>
    %c0_12 = arith.constant 0 : index
    %c0_13 = arith.constant 0 : index
    %18 = vector.load %arg6[%c0_12, %c0_13] : memref<256x128xbf16, #tpu.memory_space<vmem>>, vector<256x128xbf16>
    %cst_14 = arith.constant dense<0.000000e+00> : vector<64x128xf32>
    %19 = tpu.matmul %17, %18, %cst_14 {dimension_numbers = #tpu.dot_dimension_numbers<[1], [0], [0], [1], [0, 0, 1, 1], [], []>} : vector<64x256xbf16>, vector<256x128xbf16>, vector<64x128xf32> -> vector<64x128xf32>
    %c0_15 = arith.constant 0 : index
    %c0_16 = arith.constant 0 : index
    %20 = vector.load %arg7[%c0_15, %c0_16] : memref<1x128xf32, #tpu.memory_space<vmem>>, vector<1x128xf32>
    %21 = vector.broadcast %20 : vector<1x128xf32> to vector<64x128xf32>
    %22 = arith.addf %19, %21 : vector<64x128xf32>
    %c0_17 = arith.constant 0 : index
    %c0_18 = arith.constant 0 : index
    %23 = vector.load %arg8[%c0_17, %c0_18] : memref<64x128xf32, #tpu.memory_space<vmem>>, vector<64x128xf32>
    tpu.vector_store %arg8[%c0_17, %c0_18], %22 {strides = array<i32>} : memref<64x128xf32, #tpu.memory_space<vmem>>, vector<64x128xf32>,
    return
  }
  func.func @transform_0(%arg0: i32) -> (i32, i32) {
    %c0_i32 = arith.constant 0 : i32
    %c0_i32_0 = arith.constant 0 : i32
    return %arg0, %c0_i32 : i32, i32
  }
  func.func @transform_1(%arg0: i32) -> (i32, i32) {
    %c0_i32 = arith.constant 0 : i32
    %c0_i32_0 = arith.constant 0 : i32
    %c0_i32_1 = arith.constant 0 : i32
    return %c0_i32, %c0_i32_0 : i32, i32
  }
  func.func @transform_2(%arg0: i32) -> (i32, i32) {
    %c0_i32 = arith.constant 0 : i32
    %c0_i32_0 = arith.constant 0 : i32
    %c0_i32_1 = arith.constant 0 : i32
    return %c0_i32, %c0_i32_0 : i32, i32
  }
  func.func @transform_3(%arg0: i32) -> (i32, i32) {
    %c0_i32 = arith.constant 0 : i32
    %c0_i32_0 = arith.constant 0 : i32
    %c0_i32_1 = arith.constant 0 : i32
    return %c0_i32, %c0_i32_0 : i32, i32
  }
  func.func @transform_4(%arg0: i32) -> (i32, i32) {
    %c0_i32 = arith.constant 0 : i32
    %c0_i32_0 = arith.constant 0 : i32
    %c0_i32_1 = arith.constant 0 : i32
    return %c0_i32, %c0_i32_0 : i32, i32
  }
  func.func @transform_5(%arg0: i32) -> (i32, i32) {
    %c0_i32 = arith.constant 0 : i32
    %c0_i32_0 = arith.constant 0 : i32
    %c0_i32_1 = arith.constant 0 : i32
    return %c0_i32, %c0_i32_0 : i32, i32
  }
  func.func @transform_6(%arg0: i32) -> (i32, i32) {
    %c0_i32 = arith.constant 0 : i32
    %c0_i32_0 = arith.constant 0 : i32
    %c0_i32_1 = arith.constant 0 : i32
    return %c0_i32, %c0_i32_0 : i32, i32
  }
  func.func @transform_7(%arg0: i32) -> (i32, i32) {
    %c0_i32 = arith.constant 0 : i32
    %c0_i32_0 = arith.constant 0 : i32
    return %arg0, %c0_i32 : i32, i32
  }
}

</mosaic_0001>

<bundles_post_ra>
// kernel: tpu_custom_call.1
= control target key start
LH: loop header
LB: loop body
LE: loop exit
PB: predicated region body
PF: predicated region fallthrough
CT: control target
= control target key end

     0   :  { %12 = vsyncpa [#allocation6], 0  ;;  %s1194_s0 = inlined_call_operand.hbm [shape: f32[50,200], index: 0, kind: input, shape index: {}]   ;;  %s1195_s1 = inlined_call_operand.hbm [shape: bf16[200,256], index: 1, kind: input, shape index: {}]   ;;  %s1196_s2 = inlined_call_operand.vmem [shape: f32[1,256], index: 2, kind: input, shape index: {}]   ;;  %s1197_s3 = inlined_call_operand.hbm [shape: bf16[256,256], index: 3, kind: input, shape index: {}]   ;;  %s1198_s4 = inlined_call_operand.vmem [shape: f32[1,256], index: 4, kind: input, shape index: {}]   ;;  %s1199_s5 = inlined_call_operand.hbm [shape: bf16[256,128], index: 5, kind: input, shape index: {}]   ;;  %s1200_s6 = inlined_call_operand.vmem [shape: f32[1,128], index: 6, kind: input, shape index: {}]   ;;  %s1201_s7 = inlined_call_operand.hbm [shape: f32[50,128], index: 7, kind: output, shape index: {}]  }
   0x1   :  { %13 = vsyncpa [#allocation9], 0 }
   0x2   :  { %14 = vsyncpa [#allocation7], 0 }
   0x3   :  { %19 = vsyncadd [#allocation6], 256  ;;  %s933_s24 = smov [#allocation5]   ;;  %s835_s28 = scalar_lea.hbm %s1194_s0, 1792 }
   0x4   :  { %s20_s25 = sshll.u32 %s933_s24, 4  ;;  %p836_p0 = scmp.ne.s32.totalorder %s1194_s0, %s835_s28  ;;  %s21_s25 = int_to_ptr.vmem [resolvable:$true] %s20_s25 }
   0x5   :  { %p839_p1 = scmp.lt.u32.totalorder %s835_s28, %s1194_s0 }
   0x7   :  { %p841_p2 = pnand %p839_p1, %p836_p0 }
   0x9   :  { %844 = shalt.err (!%p841_p2)
}
   0xa   :  { %s845_s10 = scalar_lea.vmem %s21_s25, 1792  ;;  %s849_s11 = scalar_lea.vmem %s21_s25, 2048 }
   0xb   :  { %p846_p3 = scmp.ne.s32.totalorder %s21_s25, %s845_s10  ;;  %p850_p4 = scmp.lt.s32.totalorder %s21_s25, %s21_s25 }
   0xc   :  { %p851_p5 = scmp.lt.s32.totalorder %s849_s11, %s845_s10 }
   0xe   :  { %p852_p6 = por %p851_p5, %p850_p4 }
  0x10   :  { %p853_p7 = pnand %p852_p6, %p846_p3 }
  0x12   :  { %856 = shalt.err (!%p853_p7)
}
  0x13   :  { %s934_s12 = smov 256   ;;  %s935_s13 = smov 16  }
  0x14   :  { %26 = dma.hbm_to_vmem [thread:$0]  %s1194_s0, 1792, %s21_s25, [#allocation6], %s934_s12, %s934_s12, %s935_s13  }
  0x15   :  { %s936_s16 = smov [#allocation8]   ;;  %s857_s20 = scalar_lea.hbm %s1195_s1, 3200 }
  0x16   :  { %s32_s17 = sshll.u32 %s936_s16, 4  ;;  %p858_p8 = scmp.ne.s32.totalorder %s1195_s1, %s857_s20  ;;  %s33_s17 = int_to_ptr.vmem [resolvable:$true] %s32_s17 }
  0x17   :  { %p861_p9 = scmp.lt.u32.totalorder %s857_s20, %s1195_s1 }
  0x19   :  { %p863_p10 = pnand %p861_p9, %p858_p8 }
  0x1b   :  { %866 = shalt.err (!%p863_p10)
}
  0x1c   :  { %s867_s26 = scalar_lea.vmem %s33_s17, 3200  ;;  %p872_p12 = scmp.lt.s32.totalorder %s33_s17, %s33_s17 }
  0x1d   :  { %p868_p11 = scmp.ne.s32.totalorder %s33_s17, %s867_s26  ;;  %p873_p13 = scmp.lt.s32.totalorder %s867_s26, %s867_s26 }
  0x1f   :  { %p874_p0 = por %p873_p13, %p872_p12 }
  0x21   :  { %p875_p1 = pnand %p874_p0, %p868_p11 }
  0x23   :  { %878 = shalt.err (!%p875_p1)
}
  0x24   :  { %s937_s0 = smov 128   ;;  %s938_s25 = smov 8  }
  0x25   :  { %38 = dma.hbm_to_vmem [thread:$0]  %s1195_s1, 3200, %s33_s17, [#allocation9], %s937_s0, %s937_s0, %s938_s25  }
  0x26   :  { %923 = dma.done.wait [#allocation6], 2048  }
  0x27   :  { %924 = vsyncadd [#allocation6], 4294965248 }
  0x28   :  { %925 = dma.done.wait [#allocation9], 3200  }
  0x29   :  { %926 = vsyncadd [#allocation9], 4294964096 }
  0x2a   :  { %s60_s29 = sld [smem:[#allocation0]]   ;;  %s939_s30 = smov [#allocation2]  }
  0x2b   :  { %s68_s8 = sshll.u32 %s939_s30, 4  ;;  %s940_s9 = smov 256   ;;  %s69_s8 = int_to_ptr.vmem [resolvable:$true] %s68_s8 }
  0x2c   :  { %72 = sst [smem:[#allocation12]] %s940_s9  ;;  %s941_s10 = smov 2  }
  0x2d   :  { %74 = sst [smem:[#allocation12 + $0x1]] %s940_s9  ;;  %s942_s11 = smov 64  }
  0x2e   :  { %76 = sst [smem:[#allocation12 + $0x2]] %s941_s10  ;;  %s943_s13 = smov 128  }
  0x2f   :  { %78 = sst [smem:[#allocation12 + $0x3]] %s942_s11  ;;  %s944_s1 = smov 4  }
  0x30   :  { %s689_s12 = sshll.u32 %s60_s29, 26  ;;  %80 = sst [smem:[#allocation12 + $0x4]] %s943_s13 }
  0x31   :  { %s690_s14 = sadd.s32 134217728, %s689_s12  ;;  %82 = sst [smem:[#allocation12 + $0x5]] %s941_s10 }
  0x32   :  { %84 = sst [smem:[#allocation12 + $0x6]] %s943_s13  ;;  %s945_s15 = smov [#allocation4]  }
  0x33   :  { %86 = sst [smem:[#allocation12 + $0x7]] %s942_s11  ;;  %s946_s16 = smov [#allocation11]  }
  0x34   :  { %88 = sst [smem:[#allocation12 + $0x8]] %s944_s1  ;;  %s947_s19 = smov [#allocation3]  }
  0x35   :  { %90 = dma.general %s1197_s3, 4096, %s69_s8, %s945_s15, %s946_s16, [#allocation12], %s690_s14, 0  }
  0x36   :  { %s99_s20 = sshll.u32 %s947_s19, 4  ;;  %s879_s23 = scalar_lea.hbm %s1199_s5, 2048  ;;  %s100_s20 = int_to_ptr.vmem [resolvable:$true] %s99_s20 }
  0x37   :  { %p880_p2 = scmp.ne.s32.totalorder %s1199_s5, %s879_s23  ;;  %p883_p3 = scmp.lt.u32.totalorder %s879_s23, %s1199_s5 }
  0x39   :  { %p885_p4 = pnand %p883_p3, %p880_p2 }
  0x3b   :  { %888 = shalt.err (!%p885_p4)  }
  0x3c   :  { %s889_s29 = scalar_lea.vmem %s100_s20, 2048  ;;  %p894_p6 = scmp.lt.s32.totalorder %s100_s20, %s100_s20 }
  0x3d   :  { %p890_p5 = scmp.ne.s32.totalorder %s100_s20, %s889_s29  ;;  %p895_p7 = scmp.lt.s32.totalorder %s889_s29, %s889_s29 }
  0x3f   :  { %p896_p8 = por %p895_p7, %p894_p6 }
  0x41   :  { %p897_p9 = pnand %p896_p8, %p890_p5 }
  0x43   :  { %900 = shalt.err (!%p897_p9)  }
  0x44   :  { %102 = dma.hbm_to_vmem [thread:$0]  %s1199_s5, 2048, %s100_s20, [#allocation4 + $0x1]  ;;  %v797_v0 = vld [vmem:[#allocation8 + $0x4] ss:$8 sps:$4 sm:$0xff]   ;;  %v799_v1 = vld [vmem:[#allocation8] ss:$8 sps:$4 sm:$0xff]   ;;  %v154_v52 = vlaneseq }
  0x45   :  { %309 = vmatprep.subr.bf16.mxu0 %v797_v0  ;;  %v800_v2 = vld [vmem:[#allocation8 + $0x14] ss:$8 sps:$4 sm:$0xff]   ;;  %v802_v3 = vld [vmem:[#allocation8 + $0x10] ss:$8 sps:$4 sm:$0xff]   ;;  %v803_v4 = vld [vmem:[#allocation8 + $0x24] ss:$8 sps:$4 sm:$0xff]  }
  0x46   :  { %310 = vmatpush1.bf16.msra.mxu0 %v799_v1  ;;  %v805_v5 = vld [vmem:[#allocation8 + $0x20] ss:$8 sps:$4 sm:$0xff]   ;;  %v806_v6 = vld [vmem:[#allocation8 + $0x34] ss:$8 sps:$4 sm:$0xff]   ;;  %v808_v7 = vld [vmem:[#allocation8 + $0x30] ss:$8 sps:$4 sm:$0xff]  }
  0x47   :  { %311 = vmatprep.subr.bf16.mxu0 %v800_v2  ;;  %v809_v8 = vld [vmem:[#allocation8 + $0x44] ss:$8 sps:$4 sm:$0xff]   ;;  %v811_v9 = vld [vmem:[#allocation8 + $0x40] ss:$8 sps:$4 sm:$0xff]   ;;  %v812_v10 = vld [vmem:[#allocation8 + $0x54] ss:$8 sps:$4 sm:$0xff]  }
  0x48   :  { %v104_v11 = vld [vmem:[#allocation5 + $0x8] sm:$0xff]  ;;  %v106_v12 = vld [vmem:[#allocation5 + $0x18] sm:$0xff]  ;;  %vm289_vm0 = vcmask 588800   ;;  %v151_v26 = vld [vmem:[#allocation8 + $0xc0] sm:$0xff]  ;;  %vm302_vm1 = vcmask 1043456   ;;  %v1035_v53 = vshrl.u32 %v154_v52, 7 }
  0x49   :  { %v120_v13 = vpack.c.bf16 %v106_v12, %v104_v11  ;;  %v814_v14 = vld [vmem:[#allocation8 + $0x50] ss:$8 sps:$4 sm:$0xff]   ;;  %v815_v15 = vld [vmem:[#allocation8 + $0x64] ss:$8 sps:$4 sm:$0xff]   ;;  %v817_v16 = vld [vmem:[#allocation8 + $0x60] ss:$8 sps:$4 sm:$0xff]   ;;  %v716_v28 = vcombine.high %v151_v26, %v151_v26  ;;  %v715_v29 = vcombine.low %v151_v26, %v151_v26 }
  0x4a   :  { %312 = vmatpush1.bf16.msra.mxu0 %v802_v3  ;;  %v818_v17 = vld [vmem:[#allocation8 + $0x74] ss:$8 sps:$4 sm:$0xff]   ;;  %v820_v18 = vld [vmem:[#allocation8 + $0x70] ss:$8 sps:$4 sm:$0xff]   ;;  %v821_v19 = vld [vmem:[#allocation8 + $0x84] ss:$8 sps:$4 sm:$0xff]  }
  0x4b   :  { %313 = vmatprep.subr.bf16.mxu0 %v803_v4  ;;  %718 = vmatprep.mubr.msk.bf16.mxu0 %vm289_vm0, %v120_v13  ;;  %v823_v20 = vld [vmem:[#allocation8 + $0x80] ss:$8 sps:$4 sm:$0xff]   ;;  %v824_v21 = vld [vmem:[#allocation8 + $0x94] ss:$8 sps:$4 sm:$0xff]   ;;  %v826_v22 = vld [vmem:[#allocation8 + $0x90] ss:$8 sps:$4 sm:$0xff]  }
  0x4c   :  { %v827_v23 = vld [vmem:[#allocation8 + $0xa4] ss:$8 sps:$4 sm:$0xff]   ;;  %v829_v24 = vld [vmem:[#allocation8 + $0xa0] ss:$8 sps:$4 sm:$0xff]   ;;  %v830_v25 = vld [vmem:[#allocation8 + $0xb4] ss:$8 sps:$4 sm:$0xff]  }
  0x4d   :  { %v832_v27 = vld [vmem:[#allocation8 + $0xb0] ss:$8 sps:$4 sm:$0xff]   ;;  %v103_v30 = vld [vmem:[#allocation5] sm:$0xff]  ;;  %v304_v32 = vsel %vm302_vm1, %v715_v29, 0  ;;  %v108_v33 = vld [vmem:[#allocation5 + $0x28] sm:$0xff]  ;;  %v156_v54 = vsub.s32 0, %v1035_v53 }
  0x4e   :  { %314 = vmatpush1.bf16.msra.mxu0 %v805_v5  ;;  %v105_v31 = vld [vmem:[#allocation5 + $0x10] sm:$0xff]  ;;  %v110_v34 = vld [vmem:[#allocation5 + $0x38] sm:$0xff]  ;;  %v107_v37 = vld [vmem:[#allocation5 + $0x20] sm:$0xff]  ;;  %v160_v56 = vsub.s32 1, %v1035_v53 }
  0x4f   :  { %315 = vmatprep.subr.bf16.mxu0 %v806_v6  ;;  %v119_v35 = vpack.c.bf16 %v105_v31, %v103_v30  ;;  %v122_v36 = vpack.c.bf16 %v110_v34, %v108_v33  ;;  %v109_v38 = vld [vmem:[#allocation5 + $0x30] sm:$0xff]  ;;  %v112_v39 = vld [vmem:[#allocation5 + $0x48] sm:$0xff]  ;;  %v114_v40 = vld [vmem:[#allocation5 + $0x58] sm:$0xff] }
  0x50   :  { %v121_v41 = vpack.c.bf16 %v109_v38, %v107_v37  ;;  %v124_v42 = vpack.c.bf16 %v114_v40, %v112_v39  ;;  %v111_v43 = vld [vmem:[#allocation5 + $0x40] sm:$0xff]  ;;  %v113_v44 = vld [vmem:[#allocation5 + $0x50] sm:$0xff]  ;;  %v116_v45 = vld [vmem:[#allocation5 + $0x68] sm:$0xff] }
  0x51   :  { %v118_v46 = vld [vmem:[#allocation5 + $0x78] sm:$0xff]  ;;  %v123_v47 = vpack.c.bf16 %v113_v44, %v111_v43  ;;  %v115_v49 = vld [vmem:[#allocation5 + $0x60] sm:$0xff]  ;;  %v117_v50 = vld [vmem:[#allocation5 + $0x70] sm:$0xff] }
  0x52   :  { %316 = vmatpush1.bf16.msra.mxu0 %v808_v7  ;;  %v126_v48 = vpack.c.bf16 %v118_v46, %v116_v45  ;;  %v125_v51 = vpack.c.bf16 %v117_v50, %v115_v49  ;;  %v152_v55 = vld [vmem:[%s1196_s2] sm:$0x3] }
  0x53   :  { %317 = vmatprep.subr.bf16.mxu0 %v809_v8  ;;  %v157_v57 = vrot.slane %v152_v55, %v156_v54  ;;  %v161_v58 = vrot.slane %v152_v55, %v160_v56 }
  0x56   :  { %318 = vmatpush1.bf16.msra.mxu0 %v811_v9 }
  0x57   :  { %319 = vmatprep.subr.bf16.mxu0 %v812_v10 }
  0x5a   :  { %320 = vmatpush1.bf16.msra.mxu0 %v814_v14 }
  0x5b   :  { %321 = vmatprep.subr.bf16.mxu0 %v815_v15 }
  0x5e   :  { %322 = vmatpush1.bf16.msra.mxu0 %v817_v16 }
  0x5f   :  { %323 = vmatprep.subr.bf16.mxu0 %v818_v17 }
  0x62   :  { %324 = vmatpush1.bf16.msra.mxu0 %v820_v18 }
  0x63   :  { %325 = vmatprep.subr.bf16.mxu0 %v821_v19 }
  0x66   :  { %326 = vmatpush1.bf16.msra.mxu0 %v823_v20 }
  0x67   :  { %327 = vmatprep.subr.bf16.mxu0 %v824_v21 }
  0x6a   :  { %328 = vmatpush1.bf16.msra.mxu0 %v826_v22 }
  0x6b   :  { %329 = vmatprep.subr.bf16.mxu0 %v827_v23 }
  0x6e   :  { %330 = vmatpush1.bf16.msra.mxu0 %v829_v24 }
  0x6f   :  { %331 = vmatprep.subr.bf16.mxu0 %v830_v25 }
  0x72   :  { %332 = vmatpush1.bf16.msra.mxu0 %v832_v27 }
  0x73   :  { %717 = vmatprep.subr.msk.bf16.mxu0 %vm302_vm1, %v716_v28 }
  0x76   :  { %334 = vmatpush1.bf16.msra.mxu0 %v304_v32 }
  0x79   :  { %342 = vmatmul.mubr.bf16.vlgmr.msra.gmra.mrb[0].mxu0 %v119_v35 }
  0x7a   :  { %719 = vmatprep.mubr.msk.bf16.mxu0 %vm289_vm0, %v122_v36 }
  0x81   :  { %352 = vmatmul.mubr.bf16.gmra.mrb[4].mxu0 %v121_v41 }
  0x82   :  { %720 = vmatprep.mubr.msk.bf16.mxu0 %vm289_vm0, %v124_v42 }
  0x89   :  { %362 = vmatmul.mubr.bf16.gmra.mrb[8].mxu0 %v123_v47 }
  0x8a   :  { %721 = vmatprep.mubr.msk.bf16.mxu0 %vm289_vm0, %v126_v48 }
  0x91   :  { %372 = vmatmul.mubr.bf16.gmra.mrb[12].mxu0 %v125_v51 }
 0x14c   :  { %v343_v59 = vpop.f32.mrb[0].mxu0 }
 0x14d   :  { %v1046_v60 = vadd.f32 %v343_v59, %v157_v57  ;;  %v345_v61 = vpop.f32.mrb[1].mxu0 }
 0x14e   :  { %v346_v62 = vadd.f32 %v345_v61, %v161_v58  ;;  %v347_v63 = vpop.f32.mrb[2].mxu0 }
 0x14f   :  { %v382_v0 = vmax.f32 %v1046_v60, 0.0  ;;  %v1049_v1 = vadd.f32 %v347_v63, %v157_v57  ;;  %v349_v2 = vpop.f32.mrb[3].mxu0 }
 0x150   :  { %v383_v3 = vmax.f32 %v346_v62, 0.0  ;;  %v350_v4 = vadd.f32 %v349_v2, %v161_v58 }
 0x151   :  { %v384_v5 = vmax.f32 %v1049_v1, 0.0 }
 0x152   :  { %v385_v6 = vmax.f32 %v350_v4, 0.0 }
 0x154   :  { %v353_v7 = vpop.f32.mrb[4].mxu0 }
 0x155   :  { %v1052_v8 = vadd.f32 %v353_v7, %v157_v57  ;;  %v355_v9 = vpop.f32.mrb[5].mxu0 }
 0x156   :  { %v1054_v10 = vadd.f32 %v355_v9, %v161_v58  ;;  %v357_v11 = vpop.f32.mrb[6].mxu0 }
 0x157   :  { %v386_v12 = vmax.f32 %v1052_v8, 0.0  ;;  %v1057_v13 = vadd.f32 %v357_v11, %v157_v57  ;;  %v359_v14 = vpop.f32.mrb[7].mxu0 }
 0x158   :  { %v387_v15 = vmax.f32 %v1054_v10, 0.0  ;;  %v1060_v16 = vadd.f32 %v359_v14, %v161_v58 }
 0x159   :  { %v388_v17 = vmax.f32 %v1057_v13, 0.0 }
 0x15a   :  { %v389_v18 = vmax.f32 %v1060_v16, 0.0 }
 0x15c   :  { %v363_v19 = vpop.f32.mrb[8].mxu0 }
 0x15d   :  { %v1064_v20 = vadd.f32 %v363_v19, %v157_v57  ;;  %v365_v21 = vpop.f32.mrb[9].mxu0 }
 0x15e   :  { %v1066_v22 = vadd.f32 %v365_v21, %v161_v58  ;;  %v367_v23 = vpop.f32.mrb[10].mxu0 }
 0x15f   :  { %v390_v24 = vmax.f32 %v1064_v20, 0.0  ;;  %v1069_v25 = vadd.f32 %v367_v23, %v157_v57  ;;  %v369_v26 = vpop.f32.mrb[11].mxu0 }
 0x160   :  { %v391_v27 = vmax.f32 %v1066_v22, 0.0  ;;  %v1072_v28 = vadd.f32 %v369_v26, %v161_v58 }
 0x161   :  { %v392_v29 = vmax.f32 %v1069_v25, 0.0 }
 0x162   :  { %v393_v30 = vmax.f32 %v1072_v28, 0.0 }
 0x164   :  { %v373_v31 = vpop.f32.mrb[12].mxu0 }
 0x165   :  { %v1076_v32 = vadd.f32 %v373_v31, %v157_v57  ;;  %v375_v33 = vpop.f32.mrb[13].mxu0 }
 0x166   :  { %v1078_v34 = vadd.f32 %v375_v33, %v161_v58  ;;  %v377_v35 = vpop.f32.mrb[14].mxu0 }
 0x167   :  { %v394_v36 = vmax.f32 %v1076_v32, 0.0  ;;  %v1081_v37 = vadd.f32 %v377_v35, %v157_v57  ;;  %v379_v38 = vpop.f32.mrb[15].mxu0 }
 0x168   :  { %v395_v39 = vmax.f32 %v1078_v34, 0.0  ;;  %v1084_v40 = vadd.f32 %v379_v38, %v161_v58 }
 0x169   :  { %v396_v41 = vmax.f32 %v1081_v37, 0.0 }
 0x16a   :  { %v397_v42 = vmax.f32 %v1084_v40, 0.0 }
 0x16b   :  { %927 = dma.done.wait [#allocation4], 4096 }
 0x16c   :  { %928 = vsyncadd [#allocation4], 4294963200  ;;  %v406_v43 = vpack.c.bf16 %v385_v6, %v383_v3  ;;  %v414_v44 = vld [vmem:[#allocation2 + $0x8] sm:$0xff]  ;;  %v413_v45 = vld [vmem:[#allocation2] sm:$0xff]  ;;  %v410_v60 = vpack.c.bf16 %v393_v30, %v391_v27  ;;  %v412_v1 = vpack.c.bf16 %v397_v42, %v395_v39 }
 0x16d   :  { %v416_v46 = vld [vmem:[#allocation2 + $0x18] sm:$0xff]  ;;  %457 = vmatprep.subr.bf16.mxu1 %v414_v44  ;;  %v415_v47 = vld [vmem:[#allocation2 + $0x10] sm:$0xff]  ;;  %v418_v48 = vld [vmem:[#allocation2 + $0x28] sm:$0xff]  ;;  %v408_v44 = vpack.c.bf16 %v389_v18, %v387_v15 }
 0x16e   :  { %489 = vmatprep.mubr.bf16.mxu1 %v406_v43  ;;  %458 = vmatpush1.bf16.msra.mxu1 %v413_v45  ;;  %v417_v49 = vld [vmem:[#allocation2 + $0x20] sm:$0xff]  ;;  %v420_v50 = vld [vmem:[#allocation2 + $0x38] sm:$0xff]  ;;  %v419_v51 = vld [vmem:[#allocation2 + $0x30] sm:$0xff]  ;;  %v405_v43 = vpack.c.bf16 %v384_v5, %v382_v0  ;;  %v407_v45 = vpack.c.bf16 %v388_v17, %v386_v12  ;;  %v409_v0 = vpack.c.bf16 %v392_v29, %v390_v24 }
 0x16f   :  { %459 = vmatprep.subr.bf16.mxu1 %v416_v46  ;;  %v422_v52 = vld [vmem:[#allocation2 + $0x48] sm:$0xff]  ;;  %v421_v55 = vld [vmem:[#allocation2 + $0x40] sm:$0xff]  ;;  %v424_v57 = vld [vmem:[#allocation2 + $0x58] sm:$0xff]  ;;  %v411_v5 = vpack.c.bf16 %v396_v41, %v394_v36 }
 0x170   :  { %v423_v58 = vld [vmem:[#allocation2 + $0x50] sm:$0xff]  ;;  %v426_v59 = vld [vmem:[#allocation2 + $0x68] sm:$0xff]  ;;  %v425_v61 = vld [vmem:[#allocation2 + $0x60] sm:$0xff] }
 0x171   :  { %v428_v62 = vld [vmem:[#allocation2 + $0x78] sm:$0xff]  ;;  %v427_v63 = vld [vmem:[#allocation2 + $0x70] sm:$0xff]  ;;  %v430_v2 = vld [vmem:[#allocation2 + $0x88] sm:$0xff] }
 0x172   :  { %460 = vmatpush1.bf16.msra.mxu1 %v415_v47  ;;  %v429_v3 = vld [vmem:[#allocation2 + $0x80] sm:$0xff]  ;;  %v432_v4 = vld [vmem:[#allocation2 + $0x98] sm:$0xff]  ;;  %v431_v6 = vld [vmem:[#allocation2 + $0x90] sm:$0xff] }
 0x173   :  { %461 = vmatprep.subr.bf16.mxu1 %v418_v48  ;;  %v434_v7 = vld [vmem:[#allocation2 + $0xa8] sm:$0xff]  ;;  %v433_v9 = vld [vmem:[#allocation2 + $0xa0] sm:$0xff]  ;;  %v436_v11 = vld [vmem:[#allocation2 + $0xb8] sm:$0xff] }
 0x174   :  { %v435_v14 = vld [vmem:[#allocation2 + $0xb0] sm:$0xff]  ;;  %v438_v19 = vld [vmem:[#allocation2 + $0xc8] sm:$0xff]  ;;  %v437_v21 = vld [vmem:[#allocation2 + $0xc0] sm:$0xff] }
 0x175   :  { %v440_v23 = vld [vmem:[#allocation2 + $0xd8] sm:$0xff]  ;;  %v439_v26 = vld [vmem:[#allocation2 + $0xd0] sm:$0xff]  ;;  %v442_v31 = vld [vmem:[#allocation2 + $0xe8] sm:$0xff] }
 0x176   :  { %462 = vmatpush1.bf16.msra.mxu1 %v417_v49  ;;  %v441_v33 = vld [vmem:[#allocation2 + $0xe0] sm:$0xff]  ;;  %v444_v35 = vld [vmem:[#allocation2 + $0xf8] sm:$0xff]  ;;  %v443_v38 = vld [vmem:[#allocation2 + $0xf0] sm:$0xff] }
 0x177   :  { %463 = vmatprep.subr.bf16.mxu1 %v420_v50  ;;  %v445_v8 = vld [vmem:[%s1198_s4] sm:$0x3] }
 0x178   :  { %v450_v10 = vrot.slane %v445_v8, %v156_v54  ;;  %v454_v12 = vrot.slane %v445_v8, %v160_v56 }
 0x17a   :  { %464 = vmatpush1.bf16.msra.mxu1 %v419_v51 }
 0x17b   :  { %465 = vmatprep.subr.bf16.mxu1 %v422_v52 }
 0x17e   :  { %466 = vmatpush1.bf16.msra.mxu1 %v421_v55 }
 0x17f   :  { %467 = vmatprep.subr.bf16.mxu1 %v424_v57 }
 0x182   :  { %468 = vmatpush1.bf16.msra.mxu1 %v423_v58 }
 0x183   :  { %469 = vmatprep.subr.bf16.mxu1 %v426_v59 }
 0x186   :  { %470 = vmatpush1.bf16.msra.mxu1 %v425_v61 }
 0x187   :  { %471 = vmatprep.subr.bf16.mxu1 %v428_v62 }
 0x18a   :  { %472 = vmatpush1.bf16.msra.mxu1 %v427_v63 }
 0x18b   :  { %473 = vmatprep.subr.bf16.mxu1 %v430_v2 }
 0x18e   :  { %474 = vmatpush1.bf16.msra.mxu1 %v429_v3 }
 0x18f   :  { %475 = vmatprep.subr.bf16.mxu1 %v432_v4 }
 0x192   :  { %476 = vmatpush1.bf16.msra.mxu1 %v431_v6 }
 0x193   :  { %477 = vmatprep.subr.bf16.mxu1 %v434_v7 }
 0x196   :  { %478 = vmatpush1.bf16.msra.mxu1 %v433_v9 }
 0x197   :  { %479 = vmatprep.subr.bf16.mxu1 %v436_v11 }
 0x19a   :  { %480 = vmatpush1.bf16.msra.mxu1 %v435_v14 }
 0x19b   :  { %481 = vmatprep.subr.bf16.mxu1 %v438_v19 }
 0x19e   :  { %482 = vmatpush1.bf16.msra.mxu1 %v437_v21 }
 0x19f   :  { %483 = vmatprep.subr.bf16.mxu1 %v440_v23 }
 0x1a2   :  { %484 = vmatpush1.bf16.msra.mxu1 %v439_v26 }
 0x1a3   :  { %485 = vmatprep.subr.bf16.mxu1 %v442_v31 }
 0x1a6   :  { %486 = vmatpush1.bf16.msra.mxu1 %v441_v33 }
 0x1a7   :  { %487 = vmatprep.subr.bf16.mxu1 %v444_v35 }
 0x1aa   :  { %488 = vmatpush1.bf16.msra.mxu1 %v443_v38 }
 0x1ad   :  { %490 = vmatmul.mubr.bf16.vlgmr.msra.gmra.mrb[0].mxu1 %v405_v43 }
 0x1ae   :  { %499 = vmatprep.mubr.bf16.mxu1 %v408_v44 }
 0x1b5   :  { %500 = vmatmul.mubr.bf16.gmra.mrb[4].mxu1 %v407_v45 }
 0x1b6   :  { %509 = vmatprep.mubr.bf16.mxu1 %v410_v60 }
 0x1bd   :  { %510 = vmatmul.mubr.bf16.gmra.mrb[8].mxu1 %v409_v0 }
 0x1be   :  { %519 = vmatprep.mubr.bf16.mxu1 %v412_v1 }
 0x1c5   :  { %520 = vmatmul.mubr.bf16.gmra.mrb[12].mxu1 %v411_v5 }
 0x280   :  { %v491_v13 = vpop.f32.mrb[0].mxu1 }
 0x281   :  { %v1123_v15 = vadd.f32 %v491_v13, %v450_v10  ;;  %v493_v16 = vpop.f32.mrb[1].mxu1 }
 0x282   :  { %v494_v17 = vadd.f32 %v493_v16, %v454_v12  ;;  %v495_v18 = vpop.f32.mrb[2].mxu1 }
 0x283   :  { %v530_v20 = vmax.f32 %v1123_v15, 0.0  ;;  %v1126_v22 = vadd.f32 %v495_v18, %v450_v10  ;;  %v497_v24 = vpop.f32.mrb[3].mxu1 }
 0x284   :  { %v531_v25 = vmax.f32 %v494_v17, 0.0  ;;  %v498_v27 = vadd.f32 %v497_v24, %v454_v12 }
 0x285   :  { %v532_v28 = vmax.f32 %v1126_v22, 0.0 }
 0x286   :  { %v533_v29 = vmax.f32 %v498_v27, 0.0 }
 0x288   :  { %v501_v54 = vpop.f32.mrb[4].mxu1 }
 0x289   :  { %v1129_v30 = vadd.f32 %v501_v54, %v450_v10  ;;  %v503_v53 = vpop.f32.mrb[5].mxu1 }
 0x28a   :  { %v1131_v56 = vadd.f32 %v503_v53, %v454_v12  ;;  %v505_v32 = vpop.f32.mrb[6].mxu1 }
 0x28b   :  { %v534_v34 = vmax.f32 %v1129_v30, 0.0  ;;  %v1134_v36 = vadd.f32 %v505_v32, %v450_v10  ;;  %v507_v37 = vpop.f32.mrb[7].mxu1 }
 0x28c   :  { %v535_v39 = vmax.f32 %v1131_v56, 0.0  ;;  %v1137_v40 = vadd.f32 %v507_v37, %v454_v12 }
 0x28d   :  { %v536_v41 = vmax.f32 %v1134_v36, 0.0 }
 0x28e   :  { %v537_v42 = vmax.f32 %v1137_v40, 0.0 }
 0x290   :  { %v511_v46 = vpop.f32.mrb[8].mxu1 }
 0x291   :  { %v1141_v47 = vadd.f32 %v511_v46, %v450_v10  ;;  %v513_v48 = vpop.f32.mrb[9].mxu1 }
 0x292   :  { %v1143_v49 = vadd.f32 %v513_v48, %v454_v12  ;;  %v515_v50 = vpop.f32.mrb[10].mxu1 }
 0x293   :  { %v538_v51 = vmax.f32 %v1141_v47, 0.0  ;;  %v1146_v52 = vadd.f32 %v515_v50, %v450_v10  ;;  %v517_v55 = vpop.f32.mrb[11].mxu1 }
 0x294   :  { %v539_v57 = vmax.f32 %v1143_v49, 0.0  ;;  %v1149_v58 = vadd.f32 %v517_v55, %v454_v12 }
 0x295   :  { %v540_v59 = vmax.f32 %v1146_v52, 0.0 }
 0x296   :  { %v541_v61 = vmax.f32 %v1149_v58, 0.0 }
 0x298   :  { %v521_v62 = vpop.f32.mrb[12].mxu1 }
 0x299   :  { %v1153_v63 = vadd.f32 %v521_v62, %v450_v10  ;;  %v523_v2 = vpop.f32.mrb[13].mxu1 }
 0x29a   :  { %v524_v3 = vadd.f32 %v523_v2, %v454_v12  ;;  %v525_v4 = vpop.f32.mrb[14].mxu1 }
 0x29b   :  { %v542_v6 = vmax.f32 %v1153_v63, 0.0  ;;  %v526_v7 = vadd.f32 %v525_v4, %v450_v10  ;;  %v527_v9 = vpop.f32.mrb[15].mxu1 }
 0x29c   :  { %v543_v11 = vmax.f32 %v524_v3, 0.0  ;;  %v528_v14 = vadd.f32 %v527_v9, %v454_v12 }
 0x29d   :  { %v544_v19 = vmax.f32 %v526_v7, 0.0 }
 0x29e   :  { %v545_v21 = vmax.f32 %v528_v14, 0.0 }
 0x29f   :  { %929 = dma.done.wait [#allocation4 + $0x1], 2048 }
 0x2a0   :  { %930 = vsyncadd [#allocation4 + $0x1], 4294965248  ;;  %v555_v23 = vpack.c.bf16 %v533_v29, %v531_v25  ;;  %v561_v26 = vpack.c.bf16 %v545_v21, %v543_v11  ;;  %v570_v31 = vld [vmem:[#allocation3 + $0x40] sm:$0xff]  ;;  %v571_v35 = vld [vmem:[#allocation3 + $0x48] sm:$0xff]  ;;  %v554_v17 = vpack.c.bf16 %v532_v28, %v530_v20  ;;  %v560_v18 = vpack.c.bf16 %v544_v19, %v542_v6 }
 0x2a1   :  { %v562_v33 = vld [vmem:[#allocation3] sm:$0xff]  ;;  %725 = vmatprep.subr.bf16.mxu0 %v570_v31  ;;  %765 = vmatprep.subr.bf16.mxu1 %v570_v31  ;;  %v563_v38 = vld [vmem:[#allocation3 + $0x8] sm:$0xff]  ;;  %v572_v43 = vld [vmem:[#allocation3 + $0x50] sm:$0xff]  ;;  %v557_v24 = vpack.c.bf16 %v537_v42, %v535_v39  ;;  %v556_v25 = vpack.c.bf16 %v536_v41, %v534_v34  ;;  %v559_v15 = vpack.c.bf16 %v541_v61, %v539_v57 }
 0x2a2   :  { %617 = vmatprep.mubr.bf16.mxu0 %v555_v23  ;;  %641 = vmatprep.mubr.bf16.mxu1 %v561_v26  ;;  %v564_v44 = vld [vmem:[#allocation3 + $0x10] sm:$0xff]  ;;  %v573_v45 = vld [vmem:[#allocation3 + $0x58] sm:$0xff]  ;;  %v574_v0 = vld [vmem:[#allocation3 + $0x60] sm:$0xff]  ;;  %v558_v20 = vpack.c.bf16 %v540_v59, %v538_v51 }
 0x2a3   :  { %726 = vmatpush3.bf16.msra.mxu0 %v562_v33  ;;  %773 = vmatpush3.bf16.msra.mxu1 %v562_v33  ;;  %v565_v60 = vld [vmem:[#allocation3 + $0x18] sm:$0xff]  ;;  %v566_v1 = vld [vmem:[#allocation3 + $0x20] sm:$0xff]  ;;  %v575_v5 = vld [vmem:[#allocation3 + $0x68] sm:$0xff] }
 0x2a4   :  { %727 = vmatprep.subr.bf16.mxu0 %v571_v35  ;;  %766 = vmatprep.subr.bf16.mxu1 %v571_v35  ;;  %v567_v8 = vld [vmem:[#allocation3 + $0x28] sm:$0xff]  ;;  %v576_v10 = vld [vmem:[#allocation3 + $0x70] sm:$0xff]  ;;  %v577_v13 = vld [vmem:[#allocation3 + $0x78] sm:$0xff] }
 0x2a5   :  { %v568_v12 = vld [vmem:[#allocation3 + $0x30] sm:$0xff]  ;;  %v569_v16 = vld [vmem:[#allocation3 + $0x38] sm:$0xff]  ;;  %v722_v28 = vld [vmem:[%s1200_s6] ss:$0 sm:$0xff] }
 0x2a7   :  { %728 = vmatpush3.bf16.msra.mxu0 %v563_v38  ;;  %774 = vmatpush3.bf16.msra.mxu1 %v563_v38 }
 0x2a8   :  { %729 = vmatprep.subr.bf16.mxu0 %v572_v43  ;;  %767 = vmatprep.subr.bf16.mxu1 %v572_v43 }
 0x2ab   :  { %730 = vmatpush3.bf16.msra.mxu0 %v564_v44  ;;  %775 = vmatpush3.bf16.msra.mxu1 %v564_v44 }
 0x2ac   :  { %731 = vmatprep.subr.bf16.mxu0 %v573_v45  ;;  %768 = vmatprep.subr.bf16.mxu1 %v573_v45 }
 0x2af   :  { %732 = vmatpush3.bf16.msra.mxu0 %v565_v60  ;;  %776 = vmatpush3.bf16.msra.mxu1 %v565_v60 }
 0x2b0   :  { %733 = vmatprep.subr.bf16.mxu0 %v574_v0  ;;  %769 = vmatprep.subr.bf16.mxu1 %v574_v0 }
 0x2b3   :  { %734 = vmatpush3.bf16.msra.mxu0 %v566_v1  ;;  %777 = vmatpush3.bf16.msra.mxu1 %v566_v1 }
 0x2b4   :  { %735 = vmatprep.subr.bf16.mxu0 %v575_v5  ;;  %770 = vmatprep.subr.bf16.mxu1 %v575_v5 }
 0x2b7   :  { %736 = vmatpush3.bf16.msra.mxu0 %v567_v8  ;;  %778 = vmatpush3.bf16.msra.mxu1 %v567_v8 }
 0x2b8   :  { %737 = vmatprep.subr.bf16.mxu0 %v576_v10  ;;  %771 = vmatprep.subr.bf16.mxu1 %v576_v10 }
 0x2bb   :  { %738 = vmatpush3.bf16.msra.mxu0 %v568_v12  ;;  %779 = vmatpush3.bf16.msra.mxu1 %v568_v12 }
 0x2bc   :  { %739 = vmatprep.subr.bf16.mxu0 %v577_v13  ;;  %772 = vmatprep.subr.bf16.mxu1 %v577_v13 }
 0x2bf   :  { %740 = vmatpush3.bf16.msra.mxu0 %v569_v16  ;;  %780 = vmatpush3.bf16.msra.mxu1 %v569_v16 }
 0x2c2   :  { %618 = vmatmul.mubr.bf16.vlgmr.msra.gmra.mrb[16].mxu0 %v554_v17  ;;  %642 = vmatmul.mubr.bf16.vlgmr.msra.gmra.mrb[16].mxu1 %v560_v18 }
 0x2c3   :  { %625 = vmatprep.mubr.bf16.mxu0 %v557_v24 }
 0x2ca   :  { %626 = vmatmul.mubr.bf16.gmra.mrb[20].mxu0 %v556_v25 }
 0x2cb   :  { %633 = vmatprep.mubr.bf16.mxu0 %v559_v15 }
 0x2d2   :  { %634 = vmatmul.mubr.bf16.gmra.mrb[24].mxu0 %v558_v20 }
 0x395   :  { %v741_v22 = vpop.f32.mrb[16].mxu0  ;;  %v759_v27 = vpop.f32.mrb[16].mxu1 }
 0x396   :  { %v742_v29 = vpop.f32.mrb[17].mxu0  ;;  %v760_v54 = vpop.f32.mrb[17].mxu1 }
 0x397   :  { %v743_v30 = vadd.f32 %v742_v29, %v741_v22  ;;  %v744_v53 = vpop.f32.mrb[18].mxu0  ;;  %v761_v56 = vadd.f32 %v760_v54, %v759_v27  ;;  %v762_v32 = vpop.f32.mrb[18].mxu1 }
 0x398   :  { %v745_v34 = vpop.f32.mrb[19].mxu0  ;;  %v763_v36 = vpop.f32.mrb[19].mxu1 }
 0x399   :  { %v620_v37 = vadd.f32 %v743_v30, %v722_v28  ;;  %v746_v39 = vadd.f32 %v745_v34, %v744_v53  ;;  %v644_v40 = vadd.f32 %v761_v56, %v722_v28  ;;  %v764_v41 = vadd.f32 %v763_v36, %v762_v32 }
 0x39b   :  { %650 = vst [vmem:[#allocation10] sm:$0xff] %v620_v37  ;;  %v623_v42 = vadd.f32 %v746_v39, %v722_v28  ;;  %656 = vst [vmem:[#allocation10 + $0x30] sm:$0xff] %v644_v40  ;;  %v647_v46 = vadd.f32 %v764_v41, %v722_v28 }
 0x39d   :  { %651 = vst [vmem:[#allocation10 + $0x8] sm:$0xff] %v623_v42  ;;  %v747_v47 = vpop.f32.mrb[20].mxu0  ;;  %657 = vst [vmem:[#allocation10 + $0x38] sm:$0xff] %v647_v46 }
 0x39e   :  { %v748_v48 = vpop.f32.mrb[21].mxu0 }
 0x39f   :  { %v749_v49 = vadd.f32 %v748_v48, %v747_v47  ;;  %v750_v50 = vpop.f32.mrb[22].mxu0 }
 0x3a0   :  { %v751_v51 = vpop.f32.mrb[23].mxu0 }
 0x3a1   :  { %v628_v52 = vadd.f32 %v749_v49, %v722_v28  ;;  %v752_v55 = vadd.f32 %v751_v51, %v750_v50 }
 0x3a3   :  { %652 = vst [vmem:[#allocation10 + $0x10] sm:$0xff] %v628_v52  ;;  %v631_v57 = vadd.f32 %v752_v55, %v722_v28 }
 0x3a5   :  { %653 = vst [vmem:[#allocation10 + $0x18] sm:$0xff] %v631_v57  ;;  %v753_v58 = vpop.f32.mrb[24].mxu0 }
 0x3a6   :  { %v754_v59 = vpop.f32.mrb[25].mxu0 }
 0x3a7   :  { %v755_v61 = vadd.f32 %v754_v59, %v753_v58  ;;  %v756_v62 = vpop.f32.mrb[26].mxu0 }
 0x3a8   :  { %v757_v63 = vpop.f32.mrb[27].mxu0 }
 0x3a9   :  { %v636_v2 = vadd.f32 %v755_v61, %v722_v28  ;;  %v758_v3 = vadd.f32 %v757_v63, %v756_v62 }
 0x3ab   :  { %654 = vst [vmem:[#allocation10 + $0x20] sm:$0xff] %v636_v2  ;;  %v639_v4 = vadd.f32 %v758_v3, %v722_v28 }
 0x3ad   :  { %655 = vst [vmem:[#allocation10 + $0x28] sm:$0xff] %v639_v4 }
 0x3ae   :  { %662 = vsyncadd [#allocation7], 128  ;;  %s948_s6 = smov [#allocation10]  }
 0x3af   :  { %s663_s11 = sshll.u32 %s948_s6, 4  ;;  %s664_s11 = int_to_ptr.vmem [resolvable:$true] %s663_s11 }
 0x3b0   :  { %s901_s12 = scalar_lea.vmem %s664_s11, 896  ;;  %s905_s13 = scalar_lea.vmem %s664_s11, 1024 }
 0x3b1   :  { %p902_p10 = scmp.ne.s32.totalorder %s664_s11, %s901_s12  ;;  %p906_p11 = scmp.lt.s32.totalorder %s664_s11, %s664_s11 }
 0x3b2   :  { %p907_p12 = scmp.lt.s32.totalorder %s905_s13, %s901_s12 }
 0x3b4   :  { %p908_p13 = por %p907_p12, %p906_p11 }
 0x3b6   :  { %p909_p0 = pnand %p908_p13, %p902_p10 }
 0x3b8   :  { %912 = shalt.err (!%p909_p0)
}
 0x3b9   :  { %s913_s15 = scalar_lea.hbm %s1201_s7, 896 }
 0x3ba   :  { %p914_p1 = scmp.ne.s32.totalorder %s1201_s7, %s913_s15  ;;  %p917_p2 = scmp.lt.u32.totalorder %s913_s15, %s1201_s7 }
 0x3bc   :  { %p919_p3 = pnand %p917_p2, %p914_p1 }
 0x3be   :  { %922 = shalt.err (!%p919_p3)
}
 0x3bf   :  { %669 = dma.vmem_to_hbm [thread:$0]  %s664_s11, 896, %s1201_s7, [#allocation7], %s937_s0, %s937_s0, %s938_s25  }
 0x3c0   :  { %931 = dma.done.wait [#allocation7], 1024  }
 0x3c1   :  { %932 = vsyncadd [#allocation7], 4294966272 }
 0x3c2   :  { %673 = vsyncpa [#allocation6], 1 }
 0x3c3   :  { %674 = vsyncpa [#allocation9], 1 }
 0x3c4   :  { %675 = vsyncpa [#allocation7], 1 }
 0x3c5   :  { %676 = vsyncmov [#allocation4] }
 0x3c8   :  { %s677_s22 = vpop.sfrf %676 }
 0x3c9   :  { %p723_p4 = scmp.ne.s32.totalorder %s677_s22, 0 }
 0x3cb   :  { %681 = shalt.err (%p723_p4)  }
 0x3cc   :  { %683 = vsyncmov [#allocation4 + $0x1] }
 0x3cf   :  { %s684_s23 = vpop.sfrf %683 }
 0x3d0   :  { %p724_p5 = scmp.ne.s32.totalorder %s684_s23, 0 }
 0x3d2   :  { %688 = shalt.err (%p724_p5)  }

// kernel: tpu_custom_call.1
= control target key start
LH: loop header
LB: loop body
LE: loop exit
PB: predicated region body
PF: predicated region fallthrough
CT: control target
= control target key end

     0   :  { %12 = vsyncpa [#allocation3], 0  ;;  %s1469_s0 = inlined_call_operand.hbm [shape: f32[50,200], index: 0, kind: input, shape index: {}]   ;;  %s1470_s1 = inlined_call_operand.hbm [shape: bf16[200,256], index: 1, kind: input, shape index: {}]   ;;  %s1471_s2 = inlined_call_operand.vmem [shape: f32[1,256], index: 2, kind: input, shape index: {}]   ;;  %s1472_s3 = inlined_call_operand.hbm [shape: bf16[256,256], index: 3, kind: input, shape index: {}]   ;;  %s1473_s4 = inlined_call_operand.vmem [shape: f32[1,256], index: 4, kind: input, shape index: {}]   ;;  %s1474_s5 = inlined_call_operand.hbm [shape: bf16[256,128], index: 5, kind: input, shape index: {}]   ;;  %s1475_s6 = inlined_call_operand.vmem [shape: f32[1,128], index: 6, kind: input, shape index: {}]   ;;  %s1476_s7 = inlined_call_operand.hbm [shape: f32[50,128], index: 7, kind: output, shape index: {}]  }
   0x1   :  { %13 = vsyncpa [#allocation6], 0 }
   0x2   :  { %14 = vsyncpa [#allocation9], 0 }
   0x3   :  { %15 = vsyncpa [#allocation4], 0 }
   0x4   :  { %20 = vsyncadd [#allocation3], 256  ;;  %s1281_s24 = smov [#allocation5]   ;;  %s1163_s28 = scalar_lea.hbm %s1470_s1, 3200 }
   0x5   :  { %s33_s25 = sshll.u32 %s1281_s24, 4  ;;  %p1164_p0 = scmp.ne.s32.totalorder %s1470_s1, %s1163_s28  ;;  %s34_s25 = int_to_ptr.vmem [resolvable:$true] %s33_s25 }
   0x6   :  { %p1167_p1 = scmp.lt.u32.totalorder %s1163_s28, %s1470_s1 }
   0x8   :  { %p1169_p2 = pnand %p1167_p1, %p1164_p0 }
   0xa   :  { %1172 = shalt.err (!%p1169_p2)
}
   0xb   :  { %s1173_s10 = scalar_lea.vmem %s34_s25, 3200  ;;  %p1178_p4 = scmp.lt.s32.totalorder %s34_s25, %s34_s25 }
   0xc   :  { %p1174_p3 = scmp.ne.s32.totalorder %s34_s25, %s1173_s10  ;;  %p1179_p5 = scmp.lt.s32.totalorder %s1173_s10, %s1173_s10 }
   0xe   :  { %p1180_p6 = por %p1179_p5, %p1178_p4 }
  0x10   :  { %p1181_p7 = pnand %p1180_p6, %p1174_p3 }
  0x12   :  { %1184 = shalt.err (!%p1181_p7)
}
  0x13   :  { %s1282_s11 = smov 128   ;;  %s1283_s12 = smov 8  }
  0x14   :  { %39 = dma.hbm_to_vmem [thread:$0]  %s1470_s1, 3200, %s34_s25, [#allocation6], %s1282_s11, %s1282_s11, %s1283_s12  }
  0x15   :  { %s1284_s15 = smov [#allocation2]   ;;  %s1185_s19 = scalar_lea.hbm %s1469_s0, 1792 }
  0x16   :  { %s21_s16 = sshll.u32 %s1284_s15, 4  ;;  %p1186_p8 = scmp.ne.s32.totalorder %s1469_s0, %s1185_s19  ;;  %s22_s16 = int_to_ptr.vmem [resolvable:$true] %s21_s16 }
  0x17   :  { %p1189_p9 = scmp.lt.u32.totalorder %s1185_s19, %s1469_s0 }
  0x19   :  { %p1191_p10 = pnand %p1189_p9, %p1186_p8 }
  0x1b   :  { %1194 = shalt.err (!%p1191_p10)
}
  0x1c   :  { %s1195_s24 = scalar_lea.vmem %s22_s16, 1792  ;;  %s1199_s1 = scalar_lea.vmem %s22_s16, 2048 }
  0x1d   :  { %p1196_p11 = scmp.ne.s32.totalorder %s22_s16, %s1195_s24  ;;  %p1200_p12 = scmp.lt.s32.totalorder %s22_s16, %s22_s16 }
  0x1e   :  { %p1201_p13 = scmp.lt.s32.totalorder %s1199_s1, %s1195_s24 }
  0x20   :  { %p1202_p0 = por %p1201_p13, %p1200_p12 }
  0x22   :  { %p1203_p1 = pnand %p1202_p0, %p1196_p11 }
  0x24   :  { %1206 = shalt.err (!%p1203_p1)
}
  0x25   :  { %s1285_s25 = smov 256   ;;  %s1286_s26 = smov 16  }
  0x26   :  { %27 = dma.hbm_to_vmem [thread:$0]  %s1469_s0, 1792, %s22_s16, [#allocation3], %s1285_s25, %s1285_s25, %s1286_s26  }
  0x27   :  { %s1287_s29 = smov [#allocation7]   ;;  %s1288_s8 = smov [#allocation8]  }
  0x28   :  { %s47_s30 = sshll.u32 %s1287_s29, 4  ;;  %s61_s9 = sshll.u32 %s1288_s8, 4  ;;  %s48_s30 = int_to_ptr.vmem [resolvable:$true] %s47_s30  ;;  %s1359_s9 = int_to_ptr.vmem [resolvable:$true] %s61_s9 }
  0x29   :  { %s1207_s14 = scalar_lea.hbm %s1472_s3, 4096 }
  0x2a   :  { %p1208_p2 = scmp.ne.s32.totalorder %s1472_s3, %s1207_s14  ;;  %p1211_p3 = scmp.lt.u32.totalorder %s1207_s14, %s1472_s3 }
  0x2c   :  { %p1213_p4 = pnand %p1211_p3, %p1208_p2 }
  0x2e   :  { %1216 = shalt.err (!%p1213_p4)
}
  0x2f   :  { %s1217_s0 = scalar_lea.vmem %s48_s30, 4096  ;;  %p1222_p6 = scmp.lt.s32.totalorder %s48_s30, %s48_s30 }
  0x30   :  { %p1218_p5 = scmp.ne.s32.totalorder %s48_s30, %s1217_s0  ;;  %p1223_p7 = scmp.lt.s32.totalorder %s1217_s0, %s1217_s0 }
  0x32   :  { %p1224_p8 = por %p1223_p7, %p1222_p6 }
  0x34   :  { %p1225_p9 = pnand %p1224_p8, %p1218_p5 }
  0x36   :  { %1228 = shalt.err (!%p1225_p9)
}
  0x37   :  { %53 = dma.hbm_to_vmem [thread:$0]  %s1472_s3, 4096, %s48_s30, [#allocation6], %s1282_s11, %s1282_s11, %s1283_s12  }
  0x38   :  { %s1229_s23 = scalar_lea.hbm %s1474_s5, 2048 }
  0x39   :  { %p1230_p10 = scmp.ne.s32.totalorder %s1474_s5, %s1229_s23  ;;  %p1233_p11 = scmp.lt.u32.totalorder %s1229_s23, %s1474_s5 }
  0x3b   :  { %p1235_p12 = pnand %p1233_p11, %p1230_p10 }
  0x3d   :  { %1238 = shalt.err (!%p1235_p12)
}
  0x3e   :  { %s1239_s27 = scalar_lea.vmem %s1359_s9, 2048  ;;  %p1244_p0 = scmp.lt.s32.totalorder %s1359_s9, %s1359_s9 }
  0x3f   :  { %p1240_p13 = scmp.ne.s32.totalorder %s1359_s9, %s1239_s27  ;;  %p1245_p1 = scmp.lt.s32.totalorder %s1239_s27, %s1239_s27 }
  0x41   :  { %p1246_p2 = por %p1245_p1, %p1244_p0 }
  0x43   :  { %p1247_p3 = pnand %p1246_p2, %p1240_p13 }
  0x45   :  { %1250 = shalt.err (!%p1247_p3)
}
  0x46   :  { %s1289_s3 = smov 64   ;;  %s1290_s28 = smov 4  }
  0x47   :  { %67 = dma.hbm_to_vmem [thread:$0]  %s1474_s5, 2048, %s1359_s9, [#allocation9], %s1289_s3, %s1289_s3, %s1290_s28  }
  0x48   :  { %1273 = dma.done.wait [#allocation3], 2048  }
  0x49   :  { %1274 = vsyncadd [#allocation3], 4294965248 }
  0x4a   :  { %1275 = dma.done.wait [#allocation6], 7296  }
  0x4b   :  { %1276 = vsyncadd [#allocation6], 4294960000 }
  0x4c   :  { %1277 = dma.done.wait [#allocation9], 2048  }
  0x4d   :  { %1278 = vsyncadd [#allocation9], 4294965248  ;;  %v1061_v0 = vld [vmem:[#allocation5 + $0x4] ss:$8 sps:$4 sm:$0xff]   ;;  %v1063_v1 = vld [vmem:[#allocation5] ss:$8 sps:$4 sm:$0xff]  }
  0x4e   :  { %289 = vmatprep.subr.bf16.mxu0 %v1061_v0  ;;  %v1064_v2 = vld [vmem:[#allocation5 + $0x14] ss:$8 sps:$4 sm:$0xff]   ;;  %v1066_v3 = vld [vmem:[#allocation5 + $0x10] ss:$8 sps:$4 sm:$0xff]   ;;  %v1067_v4 = vld [vmem:[#allocation5 + $0x24] ss:$8 sps:$4 sm:$0xff]  }
  0x4f   :  { %290 = vmatpush1.bf16.msra.mxu0 %v1063_v1  ;;  %v1069_v5 = vld [vmem:[#allocation5 + $0x20] ss:$8 sps:$4 sm:$0xff]   ;;  %v1070_v6 = vld [vmem:[#allocation5 + $0x34] ss:$8 sps:$4 sm:$0xff]   ;;  %v1072_v7 = vld [vmem:[#allocation5 + $0x30] ss:$8 sps:$4 sm:$0xff]  }
  0x50   :  { %291 = vmatprep.subr.bf16.mxu0 %v1064_v2  ;;  %v1073_v8 = vld [vmem:[#allocation5 + $0x44] ss:$8 sps:$4 sm:$0xff]   ;;  %v1075_v9 = vld [vmem:[#allocation5 + $0x40] ss:$8 sps:$4 sm:$0xff]   ;;  %v1076_v10 = vld [vmem:[#allocation5 + $0x54] ss:$8 sps:$4 sm:$0xff]  }
  0x51   :  { %v84_v11 = vld [vmem:[#allocation2 + $0x8] sm:$0xff]  ;;  %v86_v12 = vld [vmem:[#allocation2 + $0x18] sm:$0xff]  ;;  %vm269_vm0 = vcmask 588800   ;;  %v131_v30 = vld [vmem:[#allocation5 + $0xc0] sm:$0xff]  ;;  %vm282_vm1 = vcmask 1043456  }
  0x52   :  { %v100_v13 = vpack.c.bf16 %v86_v12, %v84_v11  ;;  %v1078_v14 = vld [vmem:[#allocation5 + $0x50] ss:$8 sps:$4 sm:$0xff]   ;;  %v1079_v15 = vld [vmem:[#allocation5 + $0x64] ss:$8 sps:$4 sm:$0xff]   ;;  %v1081_v16 = vld [vmem:[#allocation5 + $0x60] ss:$8 sps:$4 sm:$0xff]   ;;  %v938_v35 = vcombine.low %v131_v30, %v131_v30  ;;  %v939_v44 = vcombine.high %v131_v30, %v131_v30 }
  0x53   :  { %292 = vmatpush1.bf16.msra.mxu0 %v1066_v3  ;;  %v1099_v17 = vld [vmem:[#allocation7 + $0x4] ss:$8 sps:$4 sm:$0xff]   ;;  %v1101_v18 = vld [vmem:[#allocation7] ss:$8 sps:$4 sm:$0xff]   ;;  %v1102_v19 = vld [vmem:[#allocation7 + $0x14] ss:$8 sps:$4 sm:$0xff]  }
  0x54   :  { %293 = vmatprep.subr.bf16.mxu0 %v1067_v4  ;;  %941 = vmatprep.mubr.msk.bf16.mxu0 %vm269_vm0, %v100_v13  ;;  %v1082_v20 = vld [vmem:[#allocation5 + $0x74] ss:$8 sps:$4 sm:$0xff]   ;;  %v1104_v21 = vld [vmem:[#allocation7 + $0x10] ss:$8 sps:$4 sm:$0xff]   ;;  %v1085_v24 = vld [vmem:[#allocation5 + $0x84] ss:$8 sps:$4 sm:$0xff]  }
  0x55   :  { %590 = vmatprep.subr.bf16.mxu1 %v1099_v17  ;;  %v1105_v22 = vld [vmem:[#allocation7 + $0x24] ss:$8 sps:$4 sm:$0xff]   ;;  %v1084_v23 = vld [vmem:[#allocation5 + $0x70] ss:$8 sps:$4 sm:$0xff]   ;;  %v1108_v26 = vld [vmem:[#allocation7 + $0x34] ss:$8 sps:$4 sm:$0xff]  }
  0x56   :  { %591 = vmatpush1.bf16.msra.mxu1 %v1101_v18  ;;  %v1107_v25 = vld [vmem:[#allocation7 + $0x20] ss:$8 sps:$4 sm:$0xff]   ;;  %v1088_v28 = vld [vmem:[#allocation5 + $0x94] ss:$8 sps:$4 sm:$0xff]   ;;  %v1110_v29 = vld [vmem:[#allocation7 + $0x30] ss:$8 sps:$4 sm:$0xff]  }
  0x57   :  { %294 = vmatpush1.bf16.msra.mxu0 %v1069_v5  ;;  %592 = vmatprep.subr.bf16.mxu1 %v1102_v19  ;;  %v1087_v27 = vld [vmem:[#allocation5 + $0x80] ss:$8 sps:$4 sm:$0xff]   ;;  %v1111_v31 = vld [vmem:[#allocation7 + $0x44] ss:$8 sps:$4 sm:$0xff]   ;;  %v1090_v32 = vld [vmem:[#allocation5 + $0x90] ss:$8 sps:$4 sm:$0xff]  }
  0x58   :  { %295 = vmatprep.subr.bf16.mxu0 %v1070_v6  ;;  %v1091_v33 = vld [vmem:[#allocation5 + $0xa4] ss:$8 sps:$4 sm:$0xff]   ;;  %v1093_v34 = vld [vmem:[#allocation5 + $0xa0] ss:$8 sps:$4 sm:$0xff]   ;;  %v1094_v37 = vld [vmem:[#allocation5 + $0xb4] ss:$8 sps:$4 sm:$0xff]  }
  0x59   :  { %v1113_v36 = vld [vmem:[#allocation7 + $0x40] ss:$8 sps:$4 sm:$0xff]   ;;  %v1114_v38 = vld [vmem:[#allocation7 + $0x54] ss:$8 sps:$4 sm:$0xff]   ;;  %v1116_v39 = vld [vmem:[#allocation7 + $0x50] ss:$8 sps:$4 sm:$0xff]  }
  0x5a   :  { %593 = vmatpush1.bf16.msra.mxu1 %v1104_v21  ;;  %v1117_v40 = vld [vmem:[#allocation7 + $0x64] ss:$8 sps:$4 sm:$0xff]   ;;  %v1096_v41 = vld [vmem:[#allocation5 + $0xb0] ss:$8 sps:$4 sm:$0xff]   ;;  %v284_v42 = vsel %vm282_vm1, %v938_v35, 0  ;;  %v83_v46 = vld [vmem:[#allocation2] sm:$0xff] }
  0x5b   :  { %296 = vmatpush1.bf16.msra.mxu0 %v1072_v7  ;;  %594 = vmatprep.subr.bf16.mxu1 %v1105_v22  ;;  %v1119_v43 = vld [vmem:[#allocation7 + $0x60] ss:$8 sps:$4 sm:$0xff]   ;;  %v1120_v45 = vld [vmem:[#allocation7 + $0x74] ss:$8 sps:$4 sm:$0xff]   ;;  %v1122_v50 = vld [vmem:[#allocation7 + $0x70] ss:$8 sps:$4 sm:$0xff]  }
  0x5c   :  { %297 = vmatprep.subr.bf16.mxu0 %v1073_v8  ;;  %v85_v47 = vld [vmem:[#allocation2 + $0x10] sm:$0xff]  ;;  %v88_v48 = vld [vmem:[#allocation2 + $0x28] sm:$0xff]  ;;  %v90_v49 = vld [vmem:[#allocation2 + $0x38] sm:$0xff] }
  0x5d   :  { %v1123_v51 = vld [vmem:[#allocation7 + $0x84] ss:$8 sps:$4 sm:$0xff]   ;;  %v99_v52 = vpack.c.bf16 %v85_v47, %v83_v46  ;;  %v102_v53 = vpack.c.bf16 %v90_v49, %v88_v48  ;;  %v1125_v54 = vld [vmem:[#allocation7 + $0x80] ss:$8 sps:$4 sm:$0xff]   ;;  %v1126_v55 = vld [vmem:[#allocation7 + $0x94] ss:$8 sps:$4 sm:$0xff]  }
  0x5e   :  { %595 = vmatpush1.bf16.msra.mxu1 %v1107_v25  ;;  %v87_v56 = vld [vmem:[#allocation2 + $0x20] sm:$0xff]  ;;  %v89_v57 = vld [vmem:[#allocation2 + $0x30] sm:$0xff]  ;;  %v92_v58 = vld [vmem:[#allocation2 + $0x48] sm:$0xff] }
  0x5f   :  { %298 = vmatpush1.bf16.msra.mxu0 %v1075_v9  ;;  %596 = vmatprep.subr.bf16.mxu1 %v1108_v26  ;;  %v94_v59 = vld [vmem:[#allocation2 + $0x58] sm:$0xff]  ;;  %v101_v61 = vpack.c.bf16 %v89_v57, %v87_v56  ;;  %v1129_v62 = vld [vmem:[#allocation7 + $0xa4] ss:$8 sps:$4 sm:$0xff]   ;;  %v1131_v0 = vld [vmem:[#allocation7 + $0xa0] ss:$8 sps:$4 sm:$0xff]  }
  0x60   :  { %299 = vmatprep.subr.bf16.mxu0 %v1076_v10  ;;  %v1128_v60 = vld [vmem:[#allocation7 + $0x90] ss:$8 sps:$4 sm:$0xff]   ;;  %v104_v63 = vpack.c.bf16 %v94_v59, %v92_v58  ;;  %v1132_v1 = vld [vmem:[#allocation7 + $0xb4] ss:$8 sps:$4 sm:$0xff]   ;;  %v93_v3 = vld [vmem:[#allocation2 + $0x50] sm:$0xff] }
  0x61   :  { %v91_v2 = vld [vmem:[#allocation2 + $0x40] sm:$0xff]  ;;  %v96_v4 = vld [vmem:[#allocation2 + $0x68] sm:$0xff]  ;;  %v98_v5 = vld [vmem:[#allocation2 + $0x78] sm:$0xff] }
  0x62   :  { %597 = vmatpush1.bf16.msra.mxu1 %v1110_v29  ;;  %v1134_v6 = vld [vmem:[#allocation7 + $0xb0] ss:$8 sps:$4 sm:$0xff]   ;;  %v103_v7 = vpack.c.bf16 %v93_v3, %v91_v2  ;;  %v1135_v8 = vld [vmem:[#allocation7 + $0xc4] ss:$8 sps:$4 sm:$0xff]   ;;  %v106_v9 = vpack.c.bf16 %v98_v5, %v96_v4  ;;  %v1137_v10 = vld [vmem:[#allocation7 + $0xc0] ss:$8 sps:$4 sm:$0xff]  }
  0x63   :  { %300 = vmatpush1.bf16.msra.mxu0 %v1078_v14  ;;  %598 = vmatprep.subr.bf16.mxu1 %v1111_v31  ;;  %v1138_v11 = vld [vmem:[#allocation7 + $0xd4] ss:$8 sps:$4 sm:$0xff]   ;;  %v97_v13 = vld [vmem:[#allocation2 + $0x70] sm:$0xff]  ;;  %v1146_v19 = vld [vmem:[#allocation7 + $0xf0] ss:$8 sps:$4 sm:$0xff]   ;;  %v134_v31 = vlaneseq }
  0x64   :  { %301 = vmatprep.subr.bf16.mxu0 %v1079_v15  ;;  %v95_v12 = vld [vmem:[#allocation2 + $0x60] sm:$0xff]  ;;  %v1143_v17 = vld [vmem:[#allocation7 + $0xe0] ss:$8 sps:$4 sm:$0xff]   ;;  %v1399_v25 = vld [vmem:[#allocation8 + $0x10] sm:$0xff]  }
  0x65   :  { %v105_v14 = vpack.c.bf16 %v97_v13, %v95_v12  ;;  %v1140_v15 = vld [vmem:[#allocation7 + $0xd0] ss:$8 sps:$4 sm:$0xff]   ;;  %v1144_v18 = vld [vmem:[#allocation7 + $0xf4] ss:$8 sps:$4 sm:$0xff]   ;;  %v1148_v21 = vld [vmem:[#allocation8] sm:$0xff]  }
  0x66   :  { %599 = vmatpush1.bf16.msra.mxu1 %v1113_v36  ;;  %v1149_v22 = vld [vmem:[#allocation8 + $0x48] sm:$0xff]   ;;  %v1401_v26 = vld [vmem:[#allocation8 + $0x58] sm:$0xff]   ;;  %v1410_v29 = vld [vmem:[#allocation8 + $0x20] sm:$0xff]  }
  0x67   :  { %302 = vmatpush1.bf16.msra.mxu0 %v1081_v16  ;;  %600 = vmatprep.subr.bf16.mxu1 %v1114_v38  ;;  %v1141_v16 = vld [vmem:[#allocation7 + $0xe4] ss:$8 sps:$4 sm:$0xff]  }
  0x68   :  { %303 = vmatprep.subr.bf16.mxu0 %v1082_v20  ;;  %v1147_v20 = vld [vmem:[#allocation8 + $0x40] sm:$0xff]   ;;  %v1413_v30 = vld [vmem:[#allocation8 + $0x68] sm:$0xff]  }
  0x6a   :  { %601 = vmatpush1.bf16.msra.mxu1 %v1116_v39 }
  0x6b   :  { %304 = vmatpush1.bf16.msra.mxu0 %v1084_v23  ;;  %602 = vmatprep.subr.bf16.mxu1 %v1117_v40  ;;  %v1150_v23 = vld [vmem:[#allocation8 + $0x8] sm:$0xff]  }
  0x6c   :  { %305 = vmatprep.subr.bf16.mxu0 %v1085_v24  ;;  %v1151_v24 = vld [vmem:[#allocation8 + $0x50] sm:$0xff]  }
  0x6e   :  { %603 = vmatpush1.bf16.msra.mxu1 %v1119_v43 }
  0x6f   :  { %306 = vmatpush1.bf16.msra.mxu0 %v1087_v27  ;;  %604 = vmatprep.subr.bf16.mxu1 %v1120_v45  ;;  %v1404_v27 = vld [vmem:[#allocation8 + $0x18] sm:$0xff]  }
  0x70   :  { %307 = vmatprep.subr.bf16.mxu0 %v1088_v28  ;;  %v1407_v28 = vld [vmem:[#allocation8 + $0x60] sm:$0xff]  }
  0x72   :  { %605 = vmatpush1.bf16.msra.mxu1 %v1122_v50 }
  0x73   :  { %308 = vmatpush1.bf16.msra.mxu0 %v1090_v32  ;;  %606 = vmatprep.subr.bf16.mxu1 %v1123_v51  ;;  %v1417_v32 = vshrl.u32 %v134_v31, 7 }
  0x74   :  { %309 = vmatprep.subr.bf16.mxu0 %v1091_v33 }
  0x75   :  { %v136_v33 = vsub.s32 0, %v1417_v32  ;;  %v140_v35 = vsub.s32 1, %v1417_v32 }
  0x76   :  { %607 = vmatpush1.bf16.msra.mxu1 %v1125_v54 }
  0x77   :  { %310 = vmatpush1.bf16.msra.mxu0 %v1093_v34  ;;  %608 = vmatprep.subr.bf16.mxu1 %v1126_v55  ;;  %v132_v34 = vld [vmem:[%s1471_s2] sm:$0x3] }
  0x78   :  { %311 = vmatprep.subr.bf16.mxu0 %v1094_v37  ;;  %v137_v36 = vrot.slane %v132_v34, %v136_v33  ;;  %v1428_v37 = vrot.slane %v132_v34, %v140_v35 }
  0x7a   :  { %609 = vmatpush1.bf16.msra.mxu1 %v1128_v60 }
  0x7b   :  { %312 = vmatpush1.bf16.msra.mxu0 %v1096_v41  ;;  %610 = vmatprep.subr.bf16.mxu1 %v1129_v62 }
  0x7c   :  { %940 = vmatprep.subr.msk.bf16.mxu0 %vm282_vm1, %v939_v44 }
  0x7e   :  { %611 = vmatpush1.bf16.msra.mxu1 %v1131_v0 }
  0x7f   :  { %314 = vmatpush1.bf16.msra.mxu0 %v284_v42  ;;  %612 = vmatprep.subr.bf16.mxu1 %v1132_v1 }
  0x80   :  { %994 = vmatprep.subr.bf16.mxu0 %v1147_v20 }
  0x82   :  { %322 = vmatmul.mubr.bf16.vlgmr.msra.gmra.mrb[0].mxu0 %v99_v52  ;;  %613 = vmatpush1.bf16.msra.mxu1 %v1134_v6 }
  0x83   :  { %942 = vmatprep.mubr.msk.bf16.mxu0 %vm269_vm0, %v102_v53  ;;  %614 = vmatprep.subr.bf16.mxu1 %v1135_v8 }
  0x84   :  { %995 = vmatpush3.bf16.msra.mxu0 %v1148_v21 }
  0x85   :  { %996 = vmatprep.subr.bf16.mxu0 %v1149_v22 }
  0x86   :  { %615 = vmatpush1.bf16.msra.mxu1 %v1137_v10 }
  0x87   :  { %616 = vmatprep.subr.bf16.mxu1 %v1138_v11 }
  0x88   :  { %997 = vmatpush3.bf16.msra.mxu0 %v1150_v23 }
  0x89   :  { %998 = vmatprep.subr.bf16.mxu0 %v1151_v24 }
  0x8a   :  { %332 = vmatmul.mubr.bf16.gmra.mrb[4].mxu0 %v101_v61  ;;  %617 = vmatpush1.bf16.msra.mxu1 %v1140_v15 }
  0x8b   :  { %943 = vmatprep.mubr.msk.bf16.mxu0 %vm269_vm0, %v104_v63  ;;  %618 = vmatprep.subr.bf16.mxu1 %v1141_v16 }
  0x8c   :  { %999 = vmatpush3.bf16.msra.mxu0 %v1399_v25 }
  0x8d   :  { %1000 = vmatprep.subr.bf16.mxu0 %v1401_v26 }
  0x8e   :  { %619 = vmatpush1.bf16.msra.mxu1 %v1143_v17 }
  0x8f   :  { %620 = vmatprep.subr.bf16.mxu1 %v1144_v18 }
  0x90   :  { %1001 = vmatpush3.bf16.msra.mxu0 %v1404_v27 }
  0x91   :  { %1002 = vmatprep.subr.bf16.mxu0 %v1407_v28 }
  0x92   :  { %342 = vmatmul.mubr.bf16.gmra.mrb[8].mxu0 %v103_v7  ;;  %621 = vmatpush1.bf16.msra.mxu1 %v1146_v19 }
  0x93   :  { %944 = vmatprep.mubr.msk.bf16.mxu0 %vm269_vm0, %v106_v9  ;;  %1034 = vmatprep.subr.bf16.mxu1 %v1147_v20 }
  0x94   :  { %1003 = vmatpush3.bf16.msra.mxu0 %v1410_v29 }
  0x95   :  { %1004 = vmatprep.subr.bf16.mxu0 %v1413_v30 }
  0x9a   :  { %352 = vmatmul.mubr.bf16.gmra.mrb[12].mxu0 %v105_v14 }
 0x155   :  { %v323_v38 = vpop.f32.mrb[0].mxu0 }
 0x156   :  { %v324_v39 = vadd.f32 %v323_v38, %v137_v36  ;;  %v325_v40 = vpop.f32.mrb[1].mxu0  ;;  %v1160_v38 = vld [vmem:[#allocation8 + $0x30] sm:$0xff]  }
 0x157   :  { %v326_v41 = vadd.f32 %v325_v40, %v1428_v37  ;;  %v327_v42 = vpop.f32.mrb[2].mxu0 }
 0x158   :  { %v328_v43 = vadd.f32 %v327_v42, %v137_v36  ;;  %v329_v44 = vpop.f32.mrb[3].mxu0  ;;  %v362_v46 = vmax.f32 %v324_v39, 0.0 }
 0x159   :  { %v330_v45 = vadd.f32 %v329_v44, %v1428_v37  ;;  %v363_v48 = vmax.f32 %v326_v41, 0.0 }
 0x15a   :  { %v364_v47 = vmax.f32 %v328_v43, 0.0 }
 0x15b   :  { %v365_v49 = vmax.f32 %v330_v45, 0.0 }
 0x15c   :  { %v378_v50 = vpack.c.bf16 %v364_v47, %v362_v46 }
 0x15d   :  { %v333_v51 = vpop.f32.mrb[4].mxu0  ;;  %v379_v52 = vpack.c.bf16 %v365_v49, %v363_v48 }
 0x15e   :  { %v334_v53 = vadd.f32 %v333_v51, %v137_v36  ;;  %v335_v54 = vpop.f32.mrb[5].mxu0 }
 0x15f   :  { %v336_v55 = vadd.f32 %v335_v54, %v1428_v37  ;;  %v337_v56 = vpop.f32.mrb[6].mxu0  ;;  %622 = vmatprep.mubr.bf16.mxu1 %v379_v52 }
 0x160   :  { %v338_v57 = vadd.f32 %v337_v56, %v137_v36  ;;  %v339_v58 = vpop.f32.mrb[7].mxu0  ;;  %623 = vmatmul.mubr.bf16.vlgmr.msra.gmra.mrb[0].mxu1 %v378_v50  ;;  %v366_v60 = vmax.f32 %v334_v53, 0.0 }
 0x161   :  { %v340_v59 = vadd.f32 %v339_v58, %v1428_v37  ;;  %1042 = vmatpush3.bf16.msra.mxu1 %v1148_v21  ;;  %v367_v62 = vmax.f32 %v336_v55, 0.0 }
 0x162   :  { %v368_v61 = vmax.f32 %v338_v57, 0.0  ;;  %1035 = vmatprep.subr.bf16.mxu1 %v1149_v22 }
 0x163   :  { %v369_v63 = vmax.f32 %v340_v59, 0.0 }
 0x164   :  { %v380_v0 = vpack.c.bf16 %v368_v61, %v366_v60 }
 0x165   :  { %v381_v1 = vpack.c.bf16 %v369_v63, %v367_v62  ;;  %v343_v2 = vpop.f32.mrb[8].mxu0  ;;  %1043 = vmatpush3.bf16.msra.mxu1 %v1150_v23 }
 0x166   :  { %v344_v3 = vadd.f32 %v343_v2, %v137_v36  ;;  %v345_v4 = vpop.f32.mrb[9].mxu0  ;;  %1036 = vmatprep.subr.bf16.mxu1 %v1151_v24 }
 0x167   :  { %v346_v5 = vadd.f32 %v345_v4, %v1428_v37  ;;  %v347_v6 = vpop.f32.mrb[10].mxu0  ;;  %632 = vmatprep.mubr.bf16.mxu1 %v381_v1 }
 0x168   :  { %v348_v7 = vadd.f32 %v347_v6, %v137_v36  ;;  %v349_v8 = vpop.f32.mrb[11].mxu0  ;;  %633 = vmatmul.mubr.bf16.gmra.mrb[4].mxu1 %v380_v0  ;;  %v370_v10 = vmax.f32 %v344_v3, 0.0 }
 0x169   :  { %v350_v9 = vadd.f32 %v349_v8, %v1428_v37  ;;  %1044 = vmatpush3.bf16.msra.mxu1 %v1399_v25  ;;  %v371_v12 = vmax.f32 %v346_v5, 0.0 }
 0x16a   :  { %v372_v11 = vmax.f32 %v348_v7, 0.0  ;;  %1037 = vmatprep.subr.bf16.mxu1 %v1401_v26 }
 0x16b   :  { %v373_v13 = vmax.f32 %v350_v9, 0.0 }
 0x16c   :  { %v382_v14 = vpack.c.bf16 %v372_v11, %v370_v10 }
 0x16d   :  { %v383_v15 = vpack.c.bf16 %v373_v13, %v371_v12  ;;  %v353_v16 = vpop.f32.mrb[12].mxu0  ;;  %1045 = vmatpush3.bf16.msra.mxu1 %v1404_v27 }
 0x16e   :  { %v354_v17 = vadd.f32 %v353_v16, %v137_v36  ;;  %v355_v18 = vpop.f32.mrb[13].mxu0  ;;  %1038 = vmatprep.subr.bf16.mxu1 %v1407_v28  ;;  %v1158_v28 = vld [vmem:[#allocation8 + $0x28] sm:$0xff]  }
 0x16f   :  { %v356_v19 = vadd.f32 %v355_v18, %v1428_v37  ;;  %v357_v20 = vpop.f32.mrb[14].mxu0  ;;  %642 = vmatprep.mubr.bf16.mxu1 %v383_v15  ;;  %1005 = vmatpush3.bf16.msra.mxu0 %v1158_v28 }
 0x170   :  { %v358_v21 = vadd.f32 %v357_v20, %v137_v36  ;;  %v359_v22 = vpop.f32.mrb[15].mxu0  ;;  %643 = vmatmul.mubr.bf16.gmra.mrb[8].mxu1 %v382_v14  ;;  %v374_v24 = vmax.f32 %v354_v17, 0.0  ;;  %v1159_v36 = vld [vmem:[#allocation8 + $0x70] sm:$0xff]  }
 0x171   :  { %v360_v23 = vadd.f32 %v359_v22, %v1428_v37  ;;  %1046 = vmatpush3.bf16.msra.mxu1 %v1410_v29  ;;  %v375_v26 = vmax.f32 %v356_v19, 0.0  ;;  %1006 = vmatprep.subr.bf16.mxu0 %v1159_v36  ;;  %v1161_v29 = vld [vmem:[#allocation8 + $0x78] sm:$0xff]  }
 0x172   :  { %v376_v25 = vmax.f32 %v358_v21, 0.0  ;;  %1039 = vmatprep.subr.bf16.mxu1 %v1413_v30  ;;  %v1162_v37 = vld [vmem:[#allocation8 + $0x38] sm:$0xff]  }
 0x173   :  { %v377_v27 = vmax.f32 %v360_v23, 0.0  ;;  %1007 = vmatpush3.bf16.msra.mxu0 %v1160_v38  ;;  %v418_v30 = vld [vmem:[%s1473_s4] sm:$0x3] }
 0x174   :  { %v384_v31 = vpack.c.bf16 %v376_v25, %v374_v24  ;;  %1008 = vmatprep.subr.bf16.mxu0 %v1161_v29  ;;  %v423_v39 = vrot.slane %v418_v30, %v136_v33  ;;  %v427_v40 = vrot.slane %v418_v30, %v140_v35 }
 0x175   :  { %v385_v34 = vpack.c.bf16 %v377_v27, %v375_v26  ;;  %1047 = vmatpush3.bf16.msra.mxu1 %v1158_v28 }
 0x176   :  { %1040 = vmatprep.subr.bf16.mxu1 %v1159_v36  ;;  %v977_v36 = vld [vmem:[%s1475_s6] ss:$0 sm:$0xff] }
 0x177   :  { %652 = vmatprep.mubr.bf16.mxu1 %v385_v34  ;;  %1009 = vmatpush3.bf16.msra.mxu0 %v1162_v37 }
 0x178   :  { %653 = vmatmul.mubr.bf16.gmra.mrb[12].mxu1 %v384_v31 }
 0x179   :  { %1048 = vmatpush3.bf16.msra.mxu1 %v1160_v38 }
 0x17a   :  { %1041 = vmatprep.subr.bf16.mxu1 %v1161_v29 }
 0x17d   :  { %1049 = vmatpush3.bf16.msra.mxu1 %v1162_v37 }
 0x233   :  { %v624_v41 = vpop.f32.mrb[0].mxu1 }
 0x234   :  { %v625_v42 = vadd.f32 %v624_v41, %v423_v39  ;;  %v626_v43 = vpop.f32.mrb[1].mxu1 }
 0x235   :  { %v627_v44 = vadd.f32 %v626_v43, %v427_v40  ;;  %v628_v45 = vpop.f32.mrb[2].mxu1 }
 0x236   :  { %v629_v46 = vadd.f32 %v628_v45, %v423_v39  ;;  %v630_v47 = vpop.f32.mrb[3].mxu1  ;;  %v663_v49 = vmax.f32 %v625_v42, 0.0 }
 0x237   :  { %v631_v48 = vadd.f32 %v630_v47, %v427_v40  ;;  %v664_v51 = vmax.f32 %v627_v44, 0.0 }
 0x238   :  { %v665_v50 = vmax.f32 %v629_v46, 0.0 }
 0x239   :  { %v666_v52 = vmax.f32 %v631_v48, 0.0 }
 0x23a   :  { %v679_v53 = vpack.c.bf16 %v665_v50, %v663_v49 }
 0x23b   :  { %v680_v54 = vpack.c.bf16 %v666_v52, %v664_v51  ;;  %v634_v55 = vpop.f32.mrb[4].mxu1 }
 0x23c   :  { %v635_v56 = vadd.f32 %v634_v55, %v423_v39  ;;  %v636_v33 = vpop.f32.mrb[5].mxu1 }
 0x23d   :  { %v637_v57 = vadd.f32 %v636_v33, %v427_v40  ;;  %v638_v32 = vpop.f32.mrb[6].mxu1  ;;  %854 = vmatprep.mubr.bf16.mxu0 %v680_v54 }
 0x23e   :  { %v639_v35 = vadd.f32 %v638_v32, %v423_v39  ;;  %v640_v58 = vpop.f32.mrb[7].mxu1  ;;  %855 = vmatmul.mubr.bf16.vlgmr.msra.gmra.mrb[16].mxu0 %v679_v53  ;;  %v667_v60 = vmax.f32 %v635_v56, 0.0 }
 0x23f   :  { %v641_v59 = vadd.f32 %v640_v58, %v427_v40  ;;  %v668_v62 = vmax.f32 %v637_v57, 0.0 }
 0x240   :  { %v669_v61 = vmax.f32 %v639_v35, 0.0 }
 0x241   :  { %v670_v63 = vmax.f32 %v641_v59, 0.0 }
 0x242   :  { %v681_v0 = vpack.c.bf16 %v669_v61, %v667_v60 }
 0x243   :  { %v682_v1 = vpack.c.bf16 %v670_v63, %v668_v62  ;;  %v644_v2 = vpop.f32.mrb[8].mxu1 }
 0x244   :  { %v645_v3 = vadd.f32 %v644_v2, %v423_v39  ;;  %v646_v4 = vpop.f32.mrb[9].mxu1 }
 0x245   :  { %v647_v5 = vadd.f32 %v646_v4, %v427_v40  ;;  %v648_v6 = vpop.f32.mrb[10].mxu1  ;;  %862 = vmatprep.mubr.bf16.mxu0 %v682_v1 }
 0x246   :  { %v649_v7 = vadd.f32 %v648_v6, %v423_v39  ;;  %v650_v8 = vpop.f32.mrb[11].mxu1  ;;  %863 = vmatmul.mubr.bf16.gmra.mrb[20].mxu0 %v681_v0  ;;  %v671_v10 = vmax.f32 %v645_v3, 0.0 }
 0x247   :  { %v651_v9 = vadd.f32 %v650_v8, %v427_v40  ;;  %v672_v12 = vmax.f32 %v647_v5, 0.0 }
 0x248   :  { %v673_v11 = vmax.f32 %v649_v7, 0.0 }
 0x249   :  { %v674_v13 = vmax.f32 %v651_v9, 0.0 }
 0x24a   :  { %v683_v14 = vpack.c.bf16 %v673_v11, %v671_v10 }
 0x24b   :  { %v684_v15 = vpack.c.bf16 %v674_v13, %v672_v12  ;;  %v654_v16 = vpop.f32.mrb[12].mxu1 }
 0x24c   :  { %v655_v17 = vadd.f32 %v654_v16, %v423_v39  ;;  %v656_v18 = vpop.f32.mrb[13].mxu1 }
 0x24d   :  { %v657_v19 = vadd.f32 %v656_v18, %v427_v40  ;;  %v658_v20 = vpop.f32.mrb[14].mxu1  ;;  %870 = vmatprep.mubr.bf16.mxu0 %v684_v15 }
 0x24e   :  { %v659_v21 = vadd.f32 %v658_v20, %v423_v39  ;;  %v660_v22 = vpop.f32.mrb[15].mxu1  ;;  %871 = vmatmul.mubr.bf16.gmra.mrb[24].mxu0 %v683_v14  ;;  %v675_v24 = vmax.f32 %v655_v17, 0.0 }
 0x24f   :  { %v661_v23 = vadd.f32 %v660_v22, %v427_v40  ;;  %v676_v26 = vmax.f32 %v657_v19, 0.0 }
 0x250   :  { %v677_v25 = vmax.f32 %v659_v21, 0.0 }
 0x251   :  { %v678_v27 = vmax.f32 %v661_v23, 0.0 }
 0x252   :  { %v685_v31 = vpack.c.bf16 %v677_v25, %v675_v24 }
 0x253   :  { %v686_v34 = vpack.c.bf16 %v678_v27, %v676_v26 }
 0x255   :  { %878 = vmatprep.mubr.bf16.mxu1 %v686_v34 }
 0x256   :  { %879 = vmatmul.mubr.bf16.vlgmr.msra.gmra.mrb[16].mxu1 %v685_v31 }
 0x311   :  { %v1010_v28 = vpop.f32.mrb[16].mxu0 }
 0x312   :  { %v1011_v38 = vpop.f32.mrb[17].mxu0 }
 0x313   :  { %v1012_v29 = vadd.f32 %v1011_v38, %v1010_v28  ;;  %v1013_v37 = vpop.f32.mrb[18].mxu0 }
 0x314   :  { %v1014_v30 = vpop.f32.mrb[19].mxu0 }
 0x315   :  { %v857_v39 = vadd.f32 %v1012_v29, %v977_v36  ;;  %v1015_v41 = vadd.f32 %v1014_v30, %v1013_v37 }
 0x317   :  { %887 = vst [vmem:[#allocation10] sm:$0xff] %v857_v39  ;;  %v860_v40 = vadd.f32 %v1015_v41, %v977_v36 }
 0x319   :  { %888 = vst [vmem:[#allocation10 + $0x8] sm:$0xff] %v860_v40  ;;  %v1016_v42 = vpop.f32.mrb[20].mxu0 }
 0x31a   :  { %v1017_v43 = vpop.f32.mrb[21].mxu0 }
 0x31b   :  { %v1018_v44 = vadd.f32 %v1017_v43, %v1016_v42  ;;  %v1019_v45 = vpop.f32.mrb[22].mxu0 }
 0x31c   :  { %v1020_v46 = vpop.f32.mrb[23].mxu0 }
 0x31d   :  { %v865_v47 = vadd.f32 %v1018_v44, %v977_v36  ;;  %v1021_v48 = vadd.f32 %v1020_v46, %v1019_v45 }
 0x31f   :  { %889 = vst [vmem:[#allocation10 + $0x10] sm:$0xff] %v865_v47  ;;  %v868_v49 = vadd.f32 %v1021_v48, %v977_v36 }
 0x321   :  { %890 = vst [vmem:[#allocation10 + $0x18] sm:$0xff] %v868_v49  ;;  %v1022_v50 = vpop.f32.mrb[24].mxu0 }
 0x322   :  { %v1023_v51 = vpop.f32.mrb[25].mxu0 }
 0x323   :  { %v1024_v52 = vadd.f32 %v1023_v51, %v1022_v50  ;;  %v1025_v53 = vpop.f32.mrb[26].mxu0 }
 0x324   :  { %v1026_v54 = vpop.f32.mrb[27].mxu0 }
 0x325   :  { %v873_v55 = vadd.f32 %v1024_v52, %v977_v36  ;;  %v1027_v56 = vadd.f32 %v1026_v54, %v1025_v53 }
 0x327   :  { %891 = vst [vmem:[#allocation10 + $0x20] sm:$0xff] %v873_v55  ;;  %v876_v33 = vadd.f32 %v1027_v56, %v977_v36 }
 0x329   :  { %892 = vst [vmem:[#allocation10 + $0x28] sm:$0xff] %v876_v33  ;;  %v1028_v57 = vpop.f32.mrb[16].mxu1 }
 0x32a   :  { %v1029_v32 = vpop.f32.mrb[17].mxu1 }
 0x32b   :  { %v1030_v35 = vadd.f32 %v1029_v32, %v1028_v57  ;;  %v1031_v58 = vpop.f32.mrb[18].mxu1 }
 0x32c   :  { %v1032_v59 = vpop.f32.mrb[19].mxu1 }
 0x32d   :  { %v881_v60 = vadd.f32 %v1030_v35, %v977_v36  ;;  %v1033_v61 = vadd.f32 %v1032_v59, %v1031_v58 }
 0x32f   :  { %893 = vst [vmem:[#allocation10 + $0x30] sm:$0xff] %v881_v60  ;;  %v884_v62 = vadd.f32 %v1033_v61, %v977_v36 }
 0x331   :  { %894 = vst [vmem:[#allocation10 + $0x38] sm:$0xff] %v884_v62 }
 0x332   :  { %899 = vsyncadd [#allocation4], 128  ;;  %s1291_s6 = smov [#allocation10]  }
 0x333   :  { %s900_s13 = sshll.u32 %s1291_s6, 4  ;;  %s901_s13 = int_to_ptr.vmem [resolvable:$true] %s900_s13 }
 0x334   :  { %s1251_s14 = scalar_lea.vmem %s901_s13, 896  ;;  %s1255_s15 = scalar_lea.vmem %s901_s13, 1024 }
 0x335   :  { %p1252_p4 = scmp.ne.s32.totalorder %s901_s13, %s1251_s14  ;;  %p1256_p5 = scmp.lt.s32.totalorder %s901_s13, %s901_s13 }
 0x336   :  { %p1257_p6 = scmp.lt.s32.totalorder %s1255_s15, %s1251_s14 }
 0x338   :  { %p1258_p7 = por %p1257_p6, %p1256_p5 }
 0x33a   :  { %p1259_p8 = pnand %p1258_p7, %p1252_p4 }
 0x33c   :  { %1262 = shalt.err (!%p1259_p8)
}
 0x33d   :  { %s1263_s19 = scalar_lea.hbm %s1476_s7, 896 }
 0x33e   :  { %p1264_p9 = scmp.ne.s32.totalorder %s1476_s7, %s1263_s19  ;;  %p1267_p10 = scmp.lt.u32.totalorder %s1263_s19, %s1476_s7 }
 0x340   :  { %p1269_p11 = pnand %p1267_p10, %p1264_p9 }
 0x342   :  { %1272 = shalt.err (!%p1269_p11)
}
 0x343   :  { %906 = dma.vmem_to_hbm [thread:$0]  %s901_s13, 896, %s1476_s7, [#allocation4], %s1282_s11, %s1282_s11, %s1283_s12  }
 0x344   :  { %1279 = dma.done.wait [#allocation4], 1024  }
 0x345   :  { %1280 = vsyncadd [#allocation4], 4294966272 }
 0x346   :  { %910 = vsyncpa [#allocation3], 1 }
 0x347   :  { %911 = vsyncpa [#allocation6], 1 }
 0x348   :  { %912 = vsyncpa [#allocation9], 1 }
 0x349   :  { %913 = vsyncpa [#allocation4], 1 }

</bundles_post_ra>
